<compile_context>
chip_gen: v7x
topology: tpu7x:2x2x1
jax: 0.10.0
libtpu: 0.0.40
codegen_flags: <defaults>
</compile_context>

<pallas_src>
import functools

import jax
import jax.numpy as jnp
from jax import lax
from jax.experimental import pallas as pl
from jax.experimental.pallas import tpu as pltpu

WIN_SIZE = 11
WIN_SIGMA = 1.5
_C1 = 0.01 ** 2  # (K1 * data_range)^2 with data_range=1.0
_C2 = 0.03 ** 2  # (K2 * data_range)^2


def _gaussian_1d(size=WIN_SIZE, sigma=WIN_SIGMA):
    coords = jnp.arange(size, dtype=jnp.float32) - size // 2
    g = jnp.exp(-(coords ** 2) / (2.0 * sigma ** 2))
    return g / jnp.sum(g)


def _filter_matrix(n, g):
    """F (n, n_out) s.t. (x @ F)[o] = sum_k x[o+k] * g[k]  ('valid' correlation)."""
    win = g.shape[0]
    n_out = n - win + 1
    j = jnp.arange(n)[:, None]
    o = jnp.arange(n_out)[None, :]
    k = j - o
    mask = (k >= 0) & (k < win)
    return jnp.where(mask, g[jnp.clip(k, 0, win - 1)], 0.0)  # (n, n_out)


def _loss_kernel(r_ref, x_ref, fh_ref, fw_ref,
                 mse_ref, l1_ref, ssim_ref,
                 acc_mse, acc_l1, acc_ssim, *, TB):
    step = pl.program_id(1)

    # Zero the VMEM accumulators at the start of every reduction row.
    @pl.when(step == 0)
    def _():
        acc_mse[...] = jnp.zeros_like(acc_mse)
        acc_l1[...] = jnp.zeros_like(acc_l1)
        acc_ssim[...] = jnp.zeros_like(acc_ssim)

    # Cast after the (possibly sub-32-bit) VMEM load; HBM traffic stays narrow.
    r = r_ref[...].astype(jnp.float32)   # (TB, H, W)
    x = x_ref[...].astype(jnp.float32)   # (TB, H, W)

    d = r - x
    # Fold over the image axis (pure vreg adds) into small (H, W) accumulators.
    acc_mse[...] += jnp.sum(d * d, axis=0)
    acc_l1[...] += jnp.sum(jnp.abs(d), axis=0)

    # SSIM on images mapped from [-1, 1] to [0, 1].
    r01 = (r + 1.0) * 0.5
    x01 = (x + 1.0) * 0.5
    rr = r01 * r01
    xx = x01 * x01
    rx = r01 * x01

    fh = fh_ref[...]                      # (Ho, H)  H-pass filter
    fw = fw_ref[...]                      # (W, Wo)  W-pass filter

    # TODO(synk): if this ever becomes MXU-bound, feed bf16 operands to the two
    # gaussian matmuls (keep preferred_element_type=f32) after re-validating the
    # E[x^2]-mu^2 cancellation precision.
    ssim_sum = None
    for b in range(TB):                   # statically unrolled per-image loop
        def filt2d(q, b=b):
            th = jnp.dot(fh, q[b], preferred_element_type=jnp.float32)   # (Ho, W)
            return jnp.dot(th, fw, preferred_element_type=jnp.float32)   # (Ho, Wo)

        mu1 = filt2d(r01)
        mu2 = filt2d(x01)
        e11 = filt2d(rr)
        e22 = filt2d(xx)
        e12 = filt2d(rx)

        mu1_sq = mu1 * mu1
        mu2_sq = mu2 * mu2
        mu12 = mu1 * mu2
        s1 = e11 - mu1_sq
        s2 = e22 - mu2_sq
        s12 = e12 - mu12

        num = (2.0 * mu12 + _C1) * (2.0 * s12 + _C2)
        den = (mu1_sq + mu2_sq + _C1) * (s1 + s2 + _C2)
        smap = num * pl.reciprocal(den, approx=True)   # EUP reciprocal, not VALU div
        ssim_sum = smap if ssim_sum is None else ssim_sum + smap

    acc_ssim[...] += ssim_sum

    # Single cross-lane reduction + scalar store per reduction row.
    @pl.when(step == pl.num_programs(1) - 1)
    def _():
        mse_ref[0] = jnp.sum(acc_mse[...], keepdims=True)
        l1_ref[0] = jnp.sum(acc_l1[...], keepdims=True)
        ssim_ref[0] = jnp.sum(acc_ssim[...], keepdims=True)


def _num_cores():
    """Number of TensorCores on the local device (1 on v5e/v6e, 2 on v7x megacore)."""
    try:
        dev = jax.devices()[0]
    except Exception:
        return 1
    for attr in ("num_cores", "core_count"):
        v = getattr(dev, attr, None)
        if isinstance(v, int) and v > 0:
            return v
    return 1


def _vmem_limit_bytes():
    """Generation-aware scoped-VMEM limit (64 MiB physical on v7x, 128 MiB on v5e/v6e)."""
    try:
        cap = int(pltpu.get_tpu_info().vmem_capacity_bytes)
    except Exception:
        cap = 64 * 1024 * 1024
    return max(32 * 1024 * 1024, min(cap * 3 // 4, 100 * 1024 * 1024))


def _choose_layout(NC, H, W, Ho, Wo, itemsize, budget_bytes, cores, max_tb=64):
    """Pick (core shards G, images-per-block TB, steps-per-shard)."""
    G = 2 if (cores >= 2 and NC % 2 == 0) else 1
    per = NC // G

    def footprint(tb):
        blk = tb * H * W
        inputs = 2 * 2 * blk * itemsize          # 2 inputs x 2 pipeline buffers
        trans = 12 * blk * 4                     # f32 casts, r01/x01, products, slack
        filt = 2 * (Ho * H + W * Wo) * 4         # double-buffered (tiny) filters
        accs = (2 * H * W + Ho * Wo) * 4         # mse/l1/ssim accumulators
        small = 10 * (Ho * W + Ho * Wo) * 4      # per-image filtered maps live at once
        return inputs + trans + filt + accs + small

    cands = [tb for tb in range(1, per + 1) if per % tb == 0 and tb <= max_tb]
    fitting = [tb for tb in cands if footprint(tb) <= budget_bytes]
    TB = max(fitting) if fitting else min(cands)   # guarded fallback: smallest legal tile
    return G, TB, per // TB


def combined_loss(recon, x, alpha=0.5, beta=0.3, gamma=0.2, *,
                  vmem_budget_bytes=None):
    N, C, H, W = x.shape
    assert recon.shape == x.shape
    NC = N * C
    Ho, Wo = H - WIN_SIZE + 1, W - WIN_SIZE + 1
    assert Ho > 0 and Wo > 0, "spatial dims must be >= 11 for SSIM window"

    vmem_limit = _vmem_limit_bytes()
    budget = int(vmem_limit * 0.7) if vmem_budget_bytes is None else int(vmem_budget_bytes)
    itemsize = jnp.dtype(x.dtype).itemsize
    G, TB, steps = _choose_layout(NC, H, W, Ho, Wo, itemsize, budget, _num_cores())

    g = _gaussian_1d()
    fh = _filter_matrix(H, g).T                               # (Ho, H)
    fw = _filter_matrix(W, g)                                 # (W, Wo)

    # Natural layout: just a free reshape, no HBM transpose/copy of the inputs.
    r3 = recon.reshape(NC, H, W)
    x3 = x.reshape(NC, H, W)

    kernel = functools.partial(_loss_kernel, TB=TB)
    out_sd = jax.ShapeDtypeStruct((G, 1, 1), jnp.float32)
    out_spec = pl.BlockSpec((1, 1, 1), lambda c, i: (c, 0, 0))
    img_spec = pl.BlockSpec((TB, H, W), lambda c, i: (c * steps + i, 0, 0))

    mse_p, l1_p, ssim_p = pl.pallas_call(
        kernel,
        out_shape=(out_sd, out_sd, out_sd),
        grid_spec=pltpu.PrefetchScalarGridSpec(
            num_scalar_prefetch=0,
            grid=(G, steps),
            in_specs=[
                img_spec,                                           # recon images
                img_spec,                                           # x images
                pl.BlockSpec((Ho, H), lambda c, i: (0, 0)),         # H-pass filter
                pl.BlockSpec((W, Wo), lambda c, i: (0, 0)),         # W-pass filter
            ],
            out_specs=(out_spec, out_spec, out_spec),
            scratch_shapes=[
                pltpu.VMEM((H, W), jnp.float32),      # mse accumulator
                pltpu.VMEM((H, W), jnp.float32),      # l1 accumulator
                pltpu.VMEM((Ho, Wo), jnp.float32),    # ssim accumulator
            ],
        ),
        compiler_params=pltpu.CompilerParams(
            dimension_semantics=("parallel", "arbitrary"),
            vmem_limit_bytes=vmem_limit,
        ),
    )(r3, x3, fh, fw)

    n_px = NC * H * W
    n_ssim = NC * Ho * Wo
    mse = jnp.sum(mse_p) / n_px
    l1 = jnp.sum(l1_p) / n_px
    ssim_val = jnp.sum(ssim_p) / n_ssim
    return alpha * mse + beta * l1 + gamma * (1.0 - ssim_val)


def _reference_loss(recon, x, alpha=0.5, beta=0.3, gamma=0.2):
    """Pure-JAX reference (depthwise 2D gaussian conv, valid padding)."""
    N, C, H, W = x.shape
    recon = recon.astype(jnp.float32)
    x = x.astype(jnp.float32)
    m = jnp.mean((recon - x) ** 2)
    l = jnp.mean(jnp.abs(recon - x))
    r01, x01 = (recon + 1.0) / 2.0, (x + 1.0) / 2.0
    g = _gaussian_1d()
    w2d = jnp.outer(g, g)                                 # (11, 11)
    w = jnp.tile(w2d[None, None], (C, 1, 1, 1))           # (C,1,11,11) depthwise

    def conv(img):
        return lax.conv_general_dilated(
            img, w, window_strides=(1, 1), padding="VALID",
            feature_group_count=C,
            dimension_numbers=("NCHW", "OIHW", "NCHW"),
            precision=lax.Precision.HIGHEST)

    mu1, mu2 = conv(r01), conv(x01)
    s1 = conv(r01 * r01) - mu1 * mu1
    s2 = conv(x01 * x01) - mu2 * mu2
    s12 = conv(r01 * x01) - mu1 * mu2
    ssim_map = ((2 * mu1 * mu2 + _C1) * (2 * s12 + _C2)) / (
        (mu1 * mu1 + mu2 * mu2 + _C1) * (s1 + s2 + _C2))
    s = jnp.mean(ssim_map)
    return alpha * m + beta * l + gamma * (1.0 - s)


if __name__ == "__main__":
    key = jax.random.PRNGKey(0)

    def make_inputs(k, shape, dtype):
        k1, k2 = jax.random.split(k)
        xx = jax.random.uniform(k1, shape, jnp.float32, -1.0, 1.0)
        rr = jnp.clip(xx + 0.1 * jax.random.normal(k2, shape, jnp.float32),
                      -1.0, 1.0)
        return rr.astype(dtype), xx.astype(dtype)

    configs = [
        # (shape,           dtype,        vmem_budget_bytes)
        ((2, 4, 16, 16), jnp.float32, None),       # auto budget -> single-step path
        ((4, 4, 16, 32), jnp.bfloat16, 150_000),   # tiny budget -> multi-step pipeline
    ]
    for idx, (shape, dtype, budget) in enumerate(configs):
        key, sub = jax.random.split(key)
        recon, x = make_inputs(sub, shape, dtype)
        fn = jax.jit(functools.partial(combined_loss, vmem_budget_bytes=budget))
        out = jax.block_until_ready(fn(recon, x))
        ref = jax.block_until_ready(_reference_loss(recon, x))
        # Tolerance accounts for the EUP approximate reciprocal in the SSIM quotient.
        if not jnp.allclose(out, ref, rtol=5e-3, atol=1e-3):
            raise AssertionError(f"config {idx}: mismatch pallas={out} ref={ref}")
    print("KERNEL_OK")
</pallas_src>

<mosaic_0001>
module attributes {stable_mosaic.version = 11 : i64} {
  func.func @_loss_kernel(%arg0: i32, %arg1: i32, %arg2: memref<8x16x16xf32, #tpu.memory_space<vmem>>, %arg3: memref<8x16x16xf32, #tpu.memory_space<vmem>>, %arg4: memref<6x16xf32, #tpu.memory_space<vmem>>, %arg5: memref<16x6xf32, #tpu.memory_space<vmem>>, %arg6: memref<1x1x1xf32, #tpu.memory_space<vmem>>, %arg7: memref<1x1x1xf32, #tpu.memory_space<vmem>>, %arg8: memref<1x1x1xf32, #tpu.memory_space<vmem>>, %arg9: memref<16x16xf32, #tpu.memory_space<vmem>>, %arg10: memref<16x16xf32, #tpu.memory_space<vmem>>, %arg11: memref<6x6xf32, #tpu.memory_space<vmem>>) attributes {dimension_semantics = [#tpu.dimension_semantics<parallel>, #tpu.dimension_semantics<arbitrary>], iteration_bounds = array<i64: 1, 1>, scalar_prefetch = 0 : i64, scratch_operands = 3 : i64, tpu.core_type = #tpu.core_type<tc>, window_params = [{transform_indices = @transform_0, window_bounds = array<i64: 8, 16, 16>}, {transform_indices = @transform_1, window_bounds = array<i64: 8, 16, 16>}, {pipeline_mode = #tpu.pipeline_mode<synchronous>, transform_indices = @transform_2, window_bounds = array<i64: 6, 16>}, {pipeline_mode = #tpu.pipeline_mode<synchronous>, transform_indices = @transform_3, window_bounds = array<i64: 16, 6>}, {transform_indices = @transform_4, window_bounds = array<i64: 1, 1, 1>}, {transform_indices = @transform_5, window_bounds = array<i64: 1, 1, 1>}, {transform_indices = @transform_6, window_bounds = array<i64: 1, 1, 1>}]} {
    %c0_i32 = arith.constant 0 : i32
    %0 = arith.cmpi eq, %arg1, %c0_i32 : i32
    %1 = arith.extui %0 : i1 to i32
    %c0_i32_0 = arith.constant 0 : i32
    %2 = arith.cmpi ne, %1, %c0_i32_0 : i32
    scf.if %2 {
      %cst_157 = arith.constant 0.000000e+00 : f32
      %394 = vector.broadcast %cst_157 : f32 to vector<16x16xf32>
      %c0_158 = arith.constant 0 : index
      %c0_159 = arith.constant 0 : index
      %395 = vector.load %arg9[%c0_158, %c0_159] : memref<16x16xf32, #tpu.memory_space<vmem>>, vector<16x16xf32>
      tpu.vector_store %arg9[%c0_158, %c0_159], %394 {strides = array<i32>} : memref<16x16xf32, #tpu.memory_space<vmem>>, vector<16x16xf32>,
      %cst_160 = arith.constant 0.000000e+00 : f32
      %396 = vector.broadcast %cst_160 : f32 to vector<16x16xf32>
      %c0_161 = arith.constant 0 : index
      %c0_162 = arith.constant 0 : index
      %397 = vector.load %arg10[%c0_161, %c0_162] : memref<16x16xf32, #tpu.memory_space<vmem>>, vector<16x16xf32>
      tpu.vector_store %arg10[%c0_161, %c0_162], %396 {strides = array<i32>} : memref<16x16xf32, #tpu.memory_space<vmem>>, vector<16x16xf32>,
      %cst_163 = arith.constant 0.000000e+00 : f32
      %398 = vector.broadcast %cst_163 : f32 to vector<6x6xf32>
      %c0_164 = arith.constant 0 : index
      %c0_165 = arith.constant 0 : index
      %399 = vector.load %arg11[%c0_164, %c0_165] : memref<6x6xf32, #tpu.memory_space<vmem>>, vector<6x6xf32>
      tpu.vector_store %arg11[%c0_164, %c0_165], %398 {strides = array<i32>} : memref<6x6xf32, #tpu.memory_space<vmem>>, vector<6x6xf32>,
    } else {
    }
    %c0 = arith.constant 0 : index
    %c0_1 = arith.constant 0 : index
    %c0_2 = arith.constant 0 : index
    %3 = vector.load %arg2[%c0, %c0_1, %c0_2] : memref<8x16x16xf32, #tpu.memory_space<vmem>>, vector<8x16x16xf32>
    %c0_3 = arith.constant 0 : index
    %c0_4 = arith.constant 0 : index
    %c0_5 = arith.constant 0 : index
    %4 = vector.load %arg3[%c0_3, %c0_4, %c0_5] : memref<8x16x16xf32, #tpu.memory_space<vmem>>, vector<8x16x16xf32>
    %5 = arith.subf %3, %4 : vector<8x16x16xf32>
    %c0_6 = arith.constant 0 : index
    %c0_7 = arith.constant 0 : index
    %6 = vector.load %arg9[%c0_6, %c0_7] : memref<16x16xf32, #tpu.memory_space<vmem>>, vector<16x16xf32>
    %7 = arith.mulf %5, %5 : vector<8x16x16xf32>
    %cst = arith.constant dense<0.000000e+00> : vector<16x16xf32>
    %8 = vector.multi_reduction <add>, %7, %cst [0] : vector<8x16x16xf32> to vector<16x16xf32>
    %9 = arith.addf %6, %8 : vector<16x16xf32>
    %c0_8 = arith.constant 0 : index
    %c0_9 = arith.constant 0 : index
    %10 = vector.load %arg9[%c0_8, %c0_9] : memref<16x16xf32, #tpu.memory_space<vmem>>, vector<16x16xf32>
    tpu.vector_store %arg9[%c0_8, %c0_9], %9 {strides = array<i32>} : memref<16x16xf32, #tpu.memory_space<vmem>>, vector<16x16xf32>,
    %c0_10 = arith.constant 0 : index
    %c0_11 = arith.constant 0 : index
    %11 = vector.load %arg10[%c0_10, %c0_11] : memref<16x16xf32, #tpu.memory_space<vmem>>, vector<16x16xf32>
    %12 = math.absf %5 : vector<8x16x16xf32>
    %cst_12 = arith.constant dense<0.000000e+00> : vector<16x16xf32>
    %13 = vector.multi_reduction <add>, %12, %cst_12 [0] : vector<8x16x16xf32> to vector<16x16xf32>
    %14 = arith.addf %11, %13 : vector<16x16xf32>
    %c0_13 = arith.constant 0 : index
    %c0_14 = arith.constant 0 : index
    %15 = vector.load %arg10[%c0_13, %c0_14] : memref<16x16xf32, #tpu.memory_space<vmem>>, vector<16x16xf32>
    tpu.vector_store %arg10[%c0_13, %c0_14], %14 {strides = array<i32>} : memref<16x16xf32, #tpu.memory_space<vmem>>, vector<16x16xf32>,
    %cst_15 = arith.constant 1.000000e+00 : f32
    %16 = vector.broadcast %cst_15 : f32 to vector<8x16x16xf32>
    %17 = arith.addf %3, %16 : vector<8x16x16xf32>
    %cst_16 = arith.constant 5.000000e-01 : f32
    %18 = vector.broadcast %cst_16 : f32 to vector<8x16x16xf32>
    %19 = arith.mulf %17, %18 : vector<8x16x16xf32>
    %cst_17 = arith.constant 1.000000e+00 : f32
    %20 = vector.broadcast %cst_17 : f32 to vector<8x16x16xf32>
    %21 = arith.addf %4, %20 : vector<8x16x16xf32>
    %cst_18 = arith.constant 5.000000e-01 : f32
    %22 = vector.broadcast %cst_18 : f32 to vector<8x16x16xf32>
    %23 = arith.mulf %21, %22 : vector<8x16x16xf32>
    %24 = arith.mulf %19, %19 : vector<8x16x16xf32>
    %25 = arith.mulf %23, %23 : vector<8x16x16xf32>
    %26 = arith.mulf %19, %23 : vector<8x16x16xf32>
    %c0_19 = arith.constant 0 : index
    %c0_20 = arith.constant 0 : index
    %27 = vector.load %arg4[%c0_19, %c0_20] : memref<6x16xf32, #tpu.memory_space<vmem>>, vector<6x16xf32>
    %c0_21 = arith.constant 0 : index
    %c0_22 = arith.constant 0 : index
    %28 = vector.load %arg5[%c0_21, %c0_22] : memref<16x6xf32, #tpu.memory_space<vmem>>, vector<16x6xf32>
    %29 = vector.extract_strided_slice %19 {offsets = [0, 0, 0], sizes = [1, 16, 16], strides = [1, 1, 1]} : vector<8x16x16xf32> to vector<1x16x16xf32>
    %30 = vector.shape_cast %29 : vector<1x16x16xf32> to vector<16x16xf32>
    %cst_23 = arith.constant dense<0.000000e+00> : vector<6x16xf32>
    %31 = tpu.matmul %27, %30, %cst_23 {dimension_numbers = #tpu.dot_dimension_numbers<[1], [0], [0], [1], [0, 0, 1, 1], [], []>} : vector<6x16xf32>, vector<16x16xf32>, vector<6x16xf32> -> vector<6x16xf32>
    %cst_24 = arith.constant dense<0.000000e+00> : vector<6x6xf32>
    %32 = tpu.matmul %31, %28, %cst_24 {dimension_numbers = #tpu.dot_dimension_numbers<[1], [0], [0], [1], [0, 0, 1, 1], [], []>} : vector<6x16xf32>, vector<16x6xf32>, vector<6x6xf32> -> vector<6x6xf32>
    %33 = vector.extract_strided_slice %23 {offsets = [0, 0, 0], sizes = [1, 16, 16], strides = [1, 1, 1]} : vector<8x16x16xf32> to vector<1x16x16xf32>
    %34 = vector.shape_cast %33 : vector<1x16x16xf32> to vector<16x16xf32>
    %cst_25 = arith.constant dense<0.000000e+00> : vector<6x16xf32>
    %35 = tpu.matmul %27, %34, %cst_25 {dimension_numbers = #tpu.dot_dimension_numbers<[1], [0], [0], [1], [0, 0, 1, 1], [], []>} : vector<6x16xf32>, vector<16x16xf32>, vector<6x16xf32> -> vector<6x16xf32>
    %cst_26 = arith.constant dense<0.000000e+00> : vector<6x6xf32>
    %36 = tpu.matmul %35, %28, %cst_26 {dimension_numbers = #tpu.dot_dimension_numbers<[1], [0], [0], [1], [0, 0, 1, 1], [], []>} : vector<6x16xf32>, vector<16x6xf32>, vector<6x6xf32> -> vector<6x6xf32>
    %37 = vector.extract_strided_slice %24 {offsets = [0, 0, 0], sizes = [1, 16, 16], strides = [1, 1, 1]} : vector<8x16x16xf32> to vector<1x16x16xf32>
    %38 = vector.shape_cast %37 : vector<1x16x16xf32> to vector<16x16xf32>
    %cst_27 = arith.constant dense<0.000000e+00> : vector<6x16xf32>
    %39 = tpu.matmul %27, %38, %cst_27 {dimension_numbers = #tpu.dot_dimension_numbers<[1], [0], [0], [1], [0, 0, 1, 1], [], []>} : vector<6x16xf32>, vector<16x16xf32>, vector<6x16xf32> -> vector<6x16xf32>
    %cst_28 = arith.constant dense<0.000000e+00> : vector<6x6xf32>
    %40 = tpu.matmul %39, %28, %cst_28 {dimension_numbers = #tpu.dot_dimension_numbers<[1], [0], [0], [1], [0, 0, 1, 1], [], []>} : vector<6x16xf32>, vector<16x6xf32>, vector<6x6xf32> -> vector<6x6xf32>
    %41 = vector.extract_strided_slice %25 {offsets = [0, 0, 0], sizes = [1, 16, 16], strides = [1, 1, 1]} : vector<8x16x16xf32> to vector<1x16x16xf32>
    %42 = vector.shape_cast %41 : vector<1x16x16xf32> to vector<16x16xf32>
    %cst_29 = arith.constant dense<0.000000e+00> : vector<6x16xf32>
    %43 = tpu.matmul %27, %42, %cst_29 {dimension_numbers = #tpu.dot_dimension_numbers<[1], [0], [0], [1], [0, 0, 1, 1], [], []>} : vector<6x16xf32>, vector<16x16xf32>, vector<6x16xf32> -> vector<6x16xf32>
    %cst_30 = arith.constant dense<0.000000e+00> : vector<6x6xf32>
    %44 = tpu.matmul %43, %28, %cst_30 {dimension_numbers = #tpu.dot_dimension_numbers<[1], [0], [0], [1], [0, 0, 1, 1], [], []>} : vector<6x16xf32>, vector<16x6xf32>, vector<6x6xf32> -> vector<6x6xf32>
    %45 = vector.extract_strided_slice %26 {offsets = [0, 0, 0], sizes = [1, 16, 16], strides = [1, 1, 1]} : vector<8x16x16xf32> to vector<1x16x16xf32>
    %46 = vector.shape_cast %45 : vector<1x16x16xf32> to vector<16x16xf32>
    %cst_31 = arith.constant dense<0.000000e+00> : vector<6x16xf32>
    %47 = tpu.matmul %27, %46, %cst_31 {dimension_numbers = #tpu.dot_dimension_numbers<[1], [0], [0], [1], [0, 0, 1, 1], [], []>} : vector<6x16xf32>, vector<16x16xf32>, vector<6x16xf32> -> vector<6x16xf32>
    %cst_32 = arith.constant dense<0.000000e+00> : vector<6x6xf32>
    %48 = tpu.matmul %47, %28, %cst_32 {dimension_numbers = #tpu.dot_dimension_numbers<[1], [0], [0], [1], [0, 0, 1, 1], [], []>} : vector<6x16xf32>, vector<16x6xf32>, vector<6x6xf32> -> vector<6x6xf32>
    %49 = arith.mulf %32, %32 : vector<6x6xf32>
    %50 = arith.mulf %36, %36 : vector<6x6xf32>
    %51 = arith.mulf %32, %36 : vector<6x6xf32>
    %52 = arith.subf %40, %49 : vector<6x6xf32>
    %53 = arith.subf %44, %50 : vector<6x6xf32>
    %54 = arith.subf %48, %51 : vector<6x6xf32>
    %cst_33 = arith.constant 2.000000e+00 : f32
    %55 = vector.broadcast %cst_33 : f32 to vector<6x6xf32>
    %56 = arith.mulf %55, %51 : vector<6x6xf32>
    %cst_34 = arith.constant 9.99999974E-5 : f32
    %57 = vector.broadcast %cst_34 : f32 to vector<6x6xf32>
    %58 = arith.addf %56, %57 : vector<6x6xf32>
    %cst_35 = arith.constant 2.000000e+00 : f32
    %59 = vector.broadcast %cst_35 : f32 to vector<6x6xf32>
    %60 = arith.mulf %59, %54 : vector<6x6xf32>
    %cst_36 = arith.constant 8.99999984E-4 : f32
    %61 = vector.broadcast %cst_36 : f32 to vector<6x6xf32>
    %62 = arith.addf %60, %61 : vector<6x6xf32>
    %63 = arith.mulf %58, %62 : vector<6x6xf32>
    %64 = arith.addf %49, %50 : vector<6x6xf32>
    %cst_37 = arith.constant 9.99999974E-5 : f32
    %65 = vector.broadcast %cst_37 : f32 to vector<6x6xf32>
    %66 = arith.addf %64, %65 : vector<6x6xf32>
    %67 = arith.addf %52, %53 : vector<6x6xf32>
    %cst_38 = arith.constant 8.99999984E-4 : f32
    %68 = vector.broadcast %cst_38 : f32 to vector<6x6xf32>
    %69 = arith.addf %67, %68 : vector<6x6xf32>
    %70 = arith.mulf %66, %69 : vector<6x6xf32>
    %71 = tpu.reciprocal %70 {approx = true} : vector<6x6xf32> -> vector<6x6xf32>
    %72 = arith.mulf %63, %71 : vector<6x6xf32>
    %73 = vector.extract_strided_slice %19 {offsets = [1, 0, 0], sizes = [1, 16, 16], strides = [1, 1, 1]} : vector<8x16x16xf32> to vector<1x16x16xf32>
    %74 = vector.shape_cast %73 : vector<1x16x16xf32> to vector<16x16xf32>
    %cst_39 = arith.constant dense<0.000000e+00> : vector<6x16xf32>
    %75 = tpu.matmul %27, %74, %cst_39 {dimension_numbers = #tpu.dot_dimension_numbers<[1], [0], [0], [1], [0, 0, 1, 1], [], []>} : vector<6x16xf32>, vector<16x16xf32>, vector<6x16xf32> -> vector<6x16xf32>
    %cst_40 = arith.constant dense<0.000000e+00> : vector<6x6xf32>
    %76 = tpu.matmul %75, %28, %cst_40 {dimension_numbers = #tpu.dot_dimension_numbers<[1], [0], [0], [1], [0, 0, 1, 1], [], []>} : vector<6x16xf32>, vector<16x6xf32>, vector<6x6xf32> -> vector<6x6xf32>
    %77 = vector.extract_strided_slice %23 {offsets = [1, 0, 0], sizes = [1, 16, 16], strides = [1, 1, 1]} : vector<8x16x16xf32> to vector<1x16x16xf32>
    %78 = vector.shape_cast %77 : vector<1x16x16xf32> to vector<16x16xf32>
    %cst_41 = arith.constant dense<0.000000e+00> : vector<6x16xf32>
    %79 = tpu.matmul %27, %78, %cst_41 {dimension_numbers = #tpu.dot_dimension_numbers<[1], [0], [0], [1], [0, 0, 1, 1], [], []>} : vector<6x16xf32>, vector<16x16xf32>, vector<6x16xf32> -> vector<6x16xf32>
    %cst_42 = arith.constant dense<0.000000e+00> : vector<6x6xf32>
    %80 = tpu.matmul %79, %28, %cst_42 {dimension_numbers = #tpu.dot_dimension_numbers<[1], [0], [0], [1], [0, 0, 1, 1], [], []>} : vector<6x16xf32>, vector<16x6xf32>, vector<6x6xf32> -> vector<6x6xf32>
    %81 = vector.extract_strided_slice %24 {offsets = [1, 0, 0], sizes = [1, 16, 16], strides = [1, 1, 1]} : vector<8x16x16xf32> to vector<1x16x16xf32>
    %82 = vector.shape_cast %81 : vector<1x16x16xf32> to vector<16x16xf32>
    %cst_43 = arith.constant dense<0.000000e+00> : vector<6x16xf32>
    %83 = tpu.matmul %27, %82, %cst_43 {dimension_numbers = #tpu.dot_dimension_numbers<[1], [0], [0], [1], [0, 0, 1, 1], [], []>} : vector<6x16xf32>, vector<16x16xf32>, vector<6x16xf32> -> vector<6x16xf32>
    %cst_44 = arith.constant dense<0.000000e+00> : vector<6x6xf32>
    %84 = tpu.matmul %83, %28, %cst_44 {dimension_numbers = #tpu.dot_dimension_numbers<[1], [0], [0], [1], [0, 0, 1, 1], [], []>} : vector<6x16xf32>, vector<16x6xf32>, vector<6x6xf32> -> vector<6x6xf32>
    %85 = vector.extract_strided_slice %25 {offsets = [1, 0, 0], sizes = [1, 16, 16], strides = [1, 1, 1]} : vector<8x16x16xf32> to vector<1x16x16xf32>
    %86 = vector.shape_cast %85 : vector<1x16x16xf32> to vector<16x16xf32>
    %cst_45 = arith.constant dense<0.000000e+00> : vector<6x16xf32>
    %87 = tpu.matmul %27, %86, %cst_45 {dimension_numbers = #tpu.dot_dimension_numbers<[1], [0], [0], [1], [0, 0, 1, 1], [], []>} : vector<6x16xf32>, vector<16x16xf32>, vector<6x16xf32> -> vector<6x16xf32>
    %cst_46 = arith.constant dense<0.000000e+00> : vector<6x6xf32>
    %88 = tpu.matmul %87, %28, %cst_46 {dimension_numbers = #tpu.dot_dimension_numbers<[1], [0], [0], [1], [0, 0, 1, 1], [], []>} : vector<6x16xf32>, vector<16x6xf32>, vector<6x6xf32> -> vector<6x6xf32>
    %89 = vector.extract_strided_slice %26 {offsets = [1, 0, 0], sizes = [1, 16, 16], strides = [1, 1, 1]} : vector<8x16x16xf32> to vector<1x16x16xf32>
    %90 = vector.shape_cast %89 : vector<1x16x16xf32> to vector<16x16xf32>
    %cst_47 = arith.constant dense<0.000000e+00> : vector<6x16xf32>
    %91 = tpu.matmul %27, %90, %cst_47 {dimension_numbers = #tpu.dot_dimension_numbers<[1], [0], [0], [1], [0, 0, 1, 1], [], []>} : vector<6x16xf32>, vector<16x16xf32>, vector<6x16xf32> -> vector<6x16xf32>
    %cst_48 = arith.constant dense<0.000000e+00> : vector<6x6xf32>
    %92 = tpu.matmul %91, %28, %cst_48 {dimension_numbers = #tpu.dot_dimension_numbers<[1], [0], [0], [1], [0, 0, 1, 1], [], []>} : vector<6x16xf32>, vector<16x6xf32>, vector<6x6xf32> -> vector<6x6xf32>
    %93 = arith.mulf %76, %76 : vector<6x6xf32>
    %94 = arith.mulf %80, %80 : vector<6x6xf32>
    %95 = arith.mulf %76, %80 : vector<6x6xf32>
    %96 = arith.subf %84, %93 : vector<6x6xf32>
    %97 = arith.subf %88, %94 : vector<6x6xf32>
    %98 = arith.subf %92, %95 : vector<6x6xf32>
    %cst_49 = arith.constant 2.000000e+00 : f32
    %99 = vector.broadcast %cst_49 : f32 to vector<6x6xf32>
    %100 = arith.mulf %99, %95 : vector<6x6xf32>
    %cst_50 = arith.constant 9.99999974E-5 : f32
    %101 = vector.broadcast %cst_50 : f32 to vector<6x6xf32>
    %102 = arith.addf %100, %101 : vector<6x6xf32>
    %cst_51 = arith.constant 2.000000e+00 : f32
    %103 = vector.broadcast %cst_51 : f32 to vector<6x6xf32>
    %104 = arith.mulf %103, %98 : vector<6x6xf32>
    %cst_52 = arith.constant 8.99999984E-4 : f32
    %105 = vector.broadcast %cst_52 : f32 to vector<6x6xf32>
    %106 = arith.addf %104, %105 : vector<6x6xf32>
    %107 = arith.mulf %102, %106 : vector<6x6xf32>
    %108 = arith.addf %93, %94 : vector<6x6xf32>
    %cst_53 = arith.constant 9.99999974E-5 : f32
    %109 = vector.broadcast %cst_53 : f32 to vector<6x6xf32>
    %110 = arith.addf %108, %109 : vector<6x6xf32>
    %111 = arith.addf %96, %97 : vector<6x6xf32>
    %cst_54 = arith.constant 8.99999984E-4 : f32
    %112 = vector.broadcast %cst_54 : f32 to vector<6x6xf32>
    %113 = arith.addf %111, %112 : vector<6x6xf32>
    %114 = arith.mulf %110, %113 : vector<6x6xf32>
    %115 = tpu.reciprocal %114 {approx = true} : vector<6x6xf32> -> vector<6x6xf32>
    %116 = arith.mulf %107, %115 : vector<6x6xf32>
    %117 = arith.addf %72, %116 : vector<6x6xf32>
    %118 = vector.extract_strided_slice %19 {offsets = [2, 0, 0], sizes = [1, 16, 16], strides = [1, 1, 1]} : vector<8x16x16xf32> to vector<1x16x16xf32>
    %119 = vector.shape_cast %118 : vector<1x16x16xf32> to vector<16x16xf32>
    %cst_55 = arith.constant dense<0.000000e+00> : vector<6x16xf32>
    %120 = tpu.matmul %27, %119, %cst_55 {dimension_numbers = #tpu.dot_dimension_numbers<[1], [0], [0], [1], [0, 0, 1, 1], [], []>} : vector<6x16xf32>, vector<16x16xf32>, vector<6x16xf32> -> vector<6x16xf32>
    %cst_56 = arith.constant dense<0.000000e+00> : vector<6x6xf32>
    %121 = tpu.matmul %120, %28, %cst_56 {dimension_numbers = #tpu.dot_dimension_numbers<[1], [0], [0], [1], [0, 0, 1, 1], [], []>} : vector<6x16xf32>, vector<16x6xf32>, vector<6x6xf32> -> vector<6x6xf32>
    %122 = vector.extract_strided_slice %23 {offsets = [2, 0, 0], sizes = [1, 16, 16], strides = [1, 1, 1]} : vector<8x16x16xf32> to vector<1x16x16xf32>
    %123 = vector.shape_cast %122 : vector<1x16x16xf32> to vector<16x16xf32>
    %cst_57 = arith.constant dense<0.000000e+00> : vector<6x16xf32>
    %124 = tpu.matmul %27, %123, %cst_57 {dimension_numbers = #tpu.dot_dimension_numbers<[1], [0], [0], [1], [0, 0, 1, 1], [], []>} : vector<6x16xf32>, vector<16x16xf32>, vector<6x16xf32> -> vector<6x16xf32>
    %cst_58 = arith.constant dense<0.000000e+00> : vector<6x6xf32>
    %125 = tpu.matmul %124, %28, %cst_58 {dimension_numbers = #tpu.dot_dimension_numbers<[1], [0], [0], [1], [0, 0, 1, 1], [], []>} : vector<6x16xf32>, vector<16x6xf32>, vector<6x6xf32> -> vector<6x6xf32>
    %126 = vector.extract_strided_slice %24 {offsets = [2, 0, 0], sizes = [1, 16, 16], strides = [1, 1, 1]} : vector<8x16x16xf32> to vector<1x16x16xf32>
    %127 = vector.shape_cast %126 : vector<1x16x16xf32> to vector<16x16xf32>
    %cst_59 = arith.constant dense<0.000000e+00> : vector<6x16xf32>
    %128 = tpu.matmul %27, %127, %cst_59 {dimension_numbers = #tpu.dot_dimension_numbers<[1], [0], [0], [1], [0, 0, 1, 1], [], []>} : vector<6x16xf32>, vector<16x16xf32>, vector<6x16xf32> -> vector<6x16xf32>
    %cst_60 = arith.constant dense<0.000000e+00> : vector<6x6xf32>
    %129 = tpu.matmul %128, %28, %cst_60 {dimension_numbers = #tpu.dot_dimension_numbers<[1], [0], [0], [1], [0, 0, 1, 1], [], []>} : vector<6x16xf32>, vector<16x6xf32>, vector<6x6xf32> -> vector<6x6xf32>
    %130 = vector.extract_strided_slice %25 {offsets = [2, 0, 0], sizes = [1, 16, 16], strides = [1, 1, 1]} : vector<8x16x16xf32> to vector<1x16x16xf32>
    %131 = vector.shape_cast %130 : vector<1x16x16xf32> to vector<16x16xf32>
    %cst_61 = arith.constant dense<0.000000e+00> : vector<6x16xf32>
    %132 = tpu.matmul %27, %131, %cst_61 {dimension_numbers = #tpu.dot_dimension_numbers<[1], [0], [0], [1], [0, 0, 1, 1], [], []>} : vector<6x16xf32>, vector<16x16xf32>, vector<6x16xf32> -> vector<6x16xf32>
    %cst_62 = arith.constant dense<0.000000e+00> : vector<6x6xf32>
    %133 = tpu.matmul %132, %28, %cst_62 {dimension_numbers = #tpu.dot_dimension_numbers<[1], [0], [0], [1], [0, 0, 1, 1], [], []>} : vector<6x16xf32>, vector<16x6xf32>, vector<6x6xf32> -> vector<6x6xf32>
    %134 = vector.extract_strided_slice %26 {offsets = [2, 0, 0], sizes = [1, 16, 16], strides = [1, 1, 1]} : vector<8x16x16xf32> to vector<1x16x16xf32>
    %135 = vector.shape_cast %134 : vector<1x16x16xf32> to vector<16x16xf32>
    %cst_63 = arith.constant dense<0.000000e+00> : vector<6x16xf32>
    %136 = tpu.matmul %27, %135, %cst_63 {dimension_numbers = #tpu.dot_dimension_numbers<[1], [0], [0], [1], [0, 0, 1, 1], [], []>} : vector<6x16xf32>, vector<16x16xf32>, vector<6x16xf32> -> vector<6x16xf32>
    %cst_64 = arith.constant dense<0.000000e+00> : vector<6x6xf32>
    %137 = tpu.matmul %136, %28, %cst_64 {dimension_numbers = #tpu.dot_dimension_numbers<[1], [0], [0], [1], [0, 0, 1, 1], [], []>} : vector<6x16xf32>, vector<16x6xf32>, vector<6x6xf32> -> vector<6x6xf32>
    %138 = arith.mulf %121, %121 : vector<6x6xf32>
    %139 = arith.mulf %125, %125 : vector<6x6xf32>
    %140 = arith.mulf %121, %125 : vector<6x6xf32>
    %141 = arith.subf %129, %138 : vector<6x6xf32>
    %142 = arith.subf %133, %139 : vector<6x6xf32>
    %143 = arith.subf %137, %140 : vector<6x6xf32>
    %cst_65 = arith.constant 2.000000e+00 : f32
    %144 = vector.broadcast %cst_65 : f32 to vector<6x6xf32>
    %145 = arith.mulf %144, %140 : vector<6x6xf32>
    %cst_66 = arith.constant 9.99999974E-5 : f32
    %146 = vector.broadcast %cst_66 : f32 to vector<6x6xf32>
    %147 = arith.addf %145, %146 : vector<6x6xf32>
    %cst_67 = arith.constant 2.000000e+00 : f32
    %148 = vector.broadcast %cst_67 : f32 to vector<6x6xf32>
    %149 = arith.mulf %148, %143 : vector<6x6xf32>
    %cst_68 = arith.constant 8.99999984E-4 : f32
    %150 = vector.broadcast %cst_68 : f32 to vector<6x6xf32>
    %151 = arith.addf %149, %150 : vector<6x6xf32>
    %152 = arith.mulf %147, %151 : vector<6x6xf32>
    %153 = arith.addf %138, %139 : vector<6x6xf32>
    %cst_69 = arith.constant 9.99999974E-5 : f32
    %154 = vector.broadcast %cst_69 : f32 to vector<6x6xf32>
    %155 = arith.addf %153, %154 : vector<6x6xf32>
    %156 = arith.addf %141, %142 : vector<6x6xf32>
    %cst_70 = arith.constant 8.99999984E-4 : f32
    %157 = vector.broadcast %cst_70 : f32 to vector<6x6xf32>
    %158 = arith.addf %156, %157 : vector<6x6xf32>
    %159 = arith.mulf %155, %158 : vector<6x6xf32>
    %160 = tpu.reciprocal %159 {approx = true} : vector<6x6xf32> -> vector<6x6xf32>
    %161 = arith.mulf %152, %160 : vector<6x6xf32>
    %162 = arith.addf %117, %161 : vector<6x6xf32>
    %163 = vector.extract_strided_slice %19 {offsets = [3, 0, 0], sizes = [1, 16, 16], strides = [1, 1, 1]} : vector<8x16x16xf32> to vector<1x16x16xf32>
    %164 = vector.shape_cast %163 : vector<1x16x16xf32> to vector<16x16xf32>
    %cst_71 = arith.constant dense<0.000000e+00> : vector<6x16xf32>
    %165 = tpu.matmul %27, %164, %cst_71 {dimension_numbers = #tpu.dot_dimension_numbers<[1], [0], [0], [1], [0, 0, 1, 1], [], []>} : vector<6x16xf32>, vector<16x16xf32>, vector<6x16xf32> -> vector<6x16xf32>
    %cst_72 = arith.constant dense<0.000000e+00> : vector<6x6xf32>
    %166 = tpu.matmul %165, %28, %cst_72 {dimension_numbers = #tpu.dot_dimension_numbers<[1], [0], [0], [1], [0, 0, 1, 1], [], []>} : vector<6x16xf32>, vector<16x6xf32>, vector<6x6xf32> -> vector<6x6xf32>
    %167 = vector.extract_strided_slice %23 {offsets = [3, 0, 0], sizes = [1, 16, 16], strides = [1, 1, 1]} : vector<8x16x16xf32> to vector<1x16x16xf32>
    %168 = vector.shape_cast %167 : vector<1x16x16xf32> to vector<16x16xf32>
    %cst_73 = arith.constant dense<0.000000e+00> : vector<6x16xf32>
    %169 = tpu.matmul %27, %168, %cst_73 {dimension_numbers = #tpu.dot_dimension_numbers<[1], [0], [0], [1], [0, 0, 1, 1], [], []>} : vector<6x16xf32>, vector<16x16xf32>, vector<6x16xf32> -> vector<6x16xf32>
    %cst_74 = arith.constant dense<0.000000e+00> : vector<6x6xf32>
    %170 = tpu.matmul %169, %28, %cst_74 {dimension_numbers = #tpu.dot_dimension_numbers<[1], [0], [0], [1], [0, 0, 1, 1], [], []>} : vector<6x16xf32>, vector<16x6xf32>, vector<6x6xf32> -> vector<6x6xf32>
    %171 = vector.extract_strided_slice %24 {offsets = [3, 0, 0], sizes = [1, 16, 16], strides = [1, 1, 1]} : vector<8x16x16xf32> to vector<1x16x16xf32>
    %172 = vector.shape_cast %171 : vector<1x16x16xf32> to vector<16x16xf32>
    %cst_75 = arith.constant dense<0.000000e+00> : vector<6x16xf32>
    %173 = tpu.matmul %27, %172, %cst_75 {dimension_numbers = #tpu.dot_dimension_numbers<[1], [0], [0], [1], [0, 0, 1, 1], [], []>} : vector<6x16xf32>, vector<16x16xf32>, vector<6x16xf32> -> vector<6x16xf32>
    %cst_76 = arith.constant dense<0.000000e+00> : vector<6x6xf32>
    %174 = tpu.matmul %173, %28, %cst_76 {dimension_numbers = #tpu.dot_dimension_numbers<[1], [0], [0], [1], [0, 0, 1, 1], [], []>} : vector<6x16xf32>, vector<16x6xf32>, vector<6x6xf32> -> vector<6x6xf32>
    %175 = vector.extract_strided_slice %25 {offsets = [3, 0, 0], sizes = [1, 16, 16], strides = [1, 1, 1]} : vector<8x16x16xf32> to vector<1x16x16xf32>
    %176 = vector.shape_cast %175 : vector<1x16x16xf32> to vector<16x16xf32>
    %cst_77 = arith.constant dense<0.000000e+00> : vector<6x16xf32>
    %177 = tpu.matmul %27, %176, %cst_77 {dimension_numbers = #tpu.dot_dimension_numbers<[1], [0], [0], [1], [0, 0, 1, 1], [], []>} : vector<6x16xf32>, vector<16x16xf32>, vector<6x16xf32> -> vector<6x16xf32>
    %cst_78 = arith.constant dense<0.000000e+00> : vector<6x6xf32>
    %178 = tpu.matmul %177, %28, %cst_78 {dimension_numbers = #tpu.dot_dimension_numbers<[1], [0], [0], [1], [0, 0, 1, 1], [], []>} : vector<6x16xf32>, vector<16x6xf32>, vector<6x6xf32> -> vector<6x6xf32>
    %179 = vector.extract_strided_slice %26 {offsets = [3, 0, 0], sizes = [1, 16, 16], strides = [1, 1, 1]} : vector<8x16x16xf32> to vector<1x16x16xf32>
    %180 = vector.shape_cast %179 : vector<1x16x16xf32> to vector<16x16xf32>
    %cst_79 = arith.constant dense<0.000000e+00> : vector<6x16xf32>
    %181 = tpu.matmul %27, %180, %cst_79 {dimension_numbers = #tpu.dot_dimension_numbers<[1], [0], [0], [1], [0, 0, 1, 1], [], []>} : vector<6x16xf32>, vector<16x16xf32>, vector<6x16xf32> -> vector<6x16xf32>
    %cst_80 = arith.constant dense<0.000000e+00> : vector<6x6xf32>
    %182 = tpu.matmul %181, %28, %cst_80 {dimension_numbers = #tpu.dot_dimension_numbers<[1], [0], [0], [1], [0, 0, 1, 1], [], []>} : vector<6x16xf32>, vector<16x6xf32>, vector<6x6xf32> -> vector<6x6xf32>
    %183 = arith.mulf %166, %166 : vector<6x6xf32>
    %184 = arith.mulf %170, %170 : vector<6x6xf32>
    %185 = arith.mulf %166, %170 : vector<6x6xf32>
    %186 = arith.subf %174, %183 : vector<6x6xf32>
    %187 = arith.subf %178, %184 : vector<6x6xf32>
    %188 = arith.subf %182, %185 : vector<6x6xf32>
    %cst_81 = arith.constant 2.000000e+00 : f32
    %189 = vector.broadcast %cst_81 : f32 to vector<6x6xf32>
    %190 = arith.mulf %189, %185 : vector<6x6xf32>
    %cst_82 = arith.constant 9.99999974E-5 : f32
    %191 = vector.broadcast %cst_82 : f32 to vector<6x6xf32>
    %192 = arith.addf %190, %191 : vector<6x6xf32>
    %cst_83 = arith.constant 2.000000e+00 : f32
    %193 = vector.broadcast %cst_83 : f32 to vector<6x6xf32>
    %194 = arith.mulf %193, %188 : vector<6x6xf32>
    %cst_84 = arith.constant 8.99999984E-4 : f32
    %195 = vector.broadcast %cst_84 : f32 to vector<6x6xf32>
    %196 = arith.addf %194, %195 : vector<6x6xf32>
    %197 = arith.mulf %192, %196 : vector<6x6xf32>
    %198 = arith.addf %183, %184 : vector<6x6xf32>
    %cst_85 = arith.constant 9.99999974E-5 : f32
    %199 = vector.broadcast %cst_85 : f32 to vector<6x6xf32>
    %200 = arith.addf %198, %199 : vector<6x6xf32>
    %201 = arith.addf %186, %187 : vector<6x6xf32>
    %cst_86 = arith.constant 8.99999984E-4 : f32
    %202 = vector.broadcast %cst_86 : f32 to vector<6x6xf32>
    %203 = arith.addf %201, %202 : vector<6x6xf32>
    %204 = arith.mulf %200, %203 : vector<6x6xf32>
    %205 = tpu.reciprocal %204 {approx = true} : vector<6x6xf32> -> vector<6x6xf32>
    %206 = arith.mulf %197, %205 : vector<6x6xf32>
    %207 = arith.addf %162, %206 : vector<6x6xf32>
    %208 = vector.extract_strided_slice %19 {offsets = [4, 0, 0], sizes = [1, 16, 16], strides = [1, 1, 1]} : vector<8x16x16xf32> to vector<1x16x16xf32>
    %209 = vector.shape_cast %208 : vector<1x16x16xf32> to vector<16x16xf32>
    %cst_87 = arith.constant dense<0.000000e+00> : vector<6x16xf32>
    %210 = tpu.matmul %27, %209, %cst_87 {dimension_numbers = #tpu.dot_dimension_numbers<[1], [0], [0], [1], [0, 0, 1, 1], [], []>} : vector<6x16xf32>, vector<16x16xf32>, vector<6x16xf32> -> vector<6x16xf32>
    %cst_88 = arith.constant dense<0.000000e+00> : vector<6x6xf32>
    %211 = tpu.matmul %210, %28, %cst_88 {dimension_numbers = #tpu.dot_dimension_numbers<[1], [0], [0], [1], [0, 0, 1, 1], [], []>} : vector<6x16xf32>, vector<16x6xf32>, vector<6x6xf32> -> vector<6x6xf32>
    %212 = vector.extract_strided_slice %23 {offsets = [4, 0, 0], sizes = [1, 16, 16], strides = [1, 1, 1]} : vector<8x16x16xf32> to vector<1x16x16xf32>
    %213 = vector.shape_cast %212 : vector<1x16x16xf32> to vector<16x16xf32>
    %cst_89 = arith.constant dense<0.000000e+00> : vector<6x16xf32>
    %214 = tpu.matmul %27, %213, %cst_89 {dimension_numbers = #tpu.dot_dimension_numbers<[1], [0], [0], [1], [0, 0, 1, 1], [], []>} : vector<6x16xf32>, vector<16x16xf32>, vector<6x16xf32> -> vector<6x16xf32>
    %cst_90 = arith.constant dense<0.000000e+00> : vector<6x6xf32>
    %215 = tpu.matmul %214, %28, %cst_90 {dimension_numbers = #tpu.dot_dimension_numbers<[1], [0], [0], [1], [0, 0, 1, 1], [], []>} : vector<6x16xf32>, vector<16x6xf32>, vector<6x6xf32> -> vector<6x6xf32>
    %216 = vector.extract_strided_slice %24 {offsets = [4, 0, 0], sizes = [1, 16, 16], strides = [1, 1, 1]} : vector<8x16x16xf32> to vector<1x16x16xf32>
    %217 = vector.shape_cast %216 : vector<1x16x16xf32> to vector<16x16xf32>
    %cst_91 = arith.constant dense<0.000000e+00> : vector<6x16xf32>
    %218 = tpu.matmul %27, %217, %cst_91 {dimension_numbers = #tpu.dot_dimension_numbers<[1], [0], [0], [1], [0, 0, 1, 1], [], []>} : vector<6x16xf32>, vector<16x16xf32>, vector<6x16xf32> -> vector<6x16xf32>
    %cst_92 = arith.constant dense<0.000000e+00> : vector<6x6xf32>
    %219 = tpu.matmul %218, %28, %cst_92 {dimension_numbers = #tpu.dot_dimension_numbers<[1], [0], [0], [1], [0, 0, 1, 1], [], []>} : vector<6x16xf32>, vector<16x6xf32>, vector<6x6xf32> -> vector<6x6xf32>
    %220 = vector.extract_strided_slice %25 {offsets = [4, 0, 0], sizes = [1, 16, 16], strides = [1, 1, 1]} : vector<8x16x16xf32> to vector<1x16x16xf32>
    %221 = vector.shape_cast %220 : vector<1x16x16xf32> to vector<16x16xf32>
    %cst_93 = arith.constant dense<0.000000e+00> : vector<6x16xf32>
    %222 = tpu.matmul %27, %221, %cst_93 {dimension_numbers = #tpu.dot_dimension_numbers<[1], [0], [0], [1], [0, 0, 1, 1], [], []>} : vector<6x16xf32>, vector<16x16xf32>, vector<6x16xf32> -> vector<6x16xf32>
    %cst_94 = arith.constant dense<0.000000e+00> : vector<6x6xf32>
    %223 = tpu.matmul %222, %28, %cst_94 {dimension_numbers = #tpu.dot_dimension_numbers<[1], [0], [0], [1], [0, 0, 1, 1], [], []>} : vector<6x16xf32>, vector<16x6xf32>, vector<6x6xf32> -> vector<6x6xf32>
    %224 = vector.extract_strided_slice %26 {offsets = [4, 0, 0], sizes = [1, 16, 16], strides = [1, 1, 1]} : vector<8x16x16xf32> to vector<1x16x16xf32>
    %225 = vector.shape_cast %224 : vector<1x16x16xf32> to vector<16x16xf32>
    %cst_95 = arith.constant dense<0.000000e+00> : vector<6x16xf32>
    %226 = tpu.matmul %27, %225, %cst_95 {dimension_numbers = #tpu.dot_dimension_numbers<[1], [0], [0], [1], [0, 0, 1, 1], [], []>} : vector<6x16xf32>, vector<16x16xf32>, vector<6x16xf32> -> vector<6x16xf32>
    %cst_96 = arith.constant dense<0.000000e+00> : vector<6x6xf32>
    %227 = tpu.matmul %226, %28, %cst_96 {dimension_numbers = #tpu.dot_dimension_numbers<[1], [0], [0], [1], [0, 0, 1, 1], [], []>} : vector<6x16xf32>, vector<16x6xf32>, vector<6x6xf32> -> vector<6x6xf32>
    %228 = arith.mulf %211, %211 : vector<6x6xf32>
    %229 = arith.mulf %215, %215 : vector<6x6xf32>
    %230 = arith.mulf %211, %215 : vector<6x6xf32>
    %231 = arith.subf %219, %228 : vector<6x6xf32>
    %232 = arith.subf %223, %229 : vector<6x6xf32>
    %233 = arith.subf %227, %230 : vector<6x6xf32>
    %cst_97 = arith.constant 2.000000e+00 : f32
    %234 = vector.broadcast %cst_97 : f32 to vector<6x6xf32>
    %235 = arith.mulf %234, %230 : vector<6x6xf32>
    %cst_98 = arith.constant 9.99999974E-5 : f32
    %236 = vector.broadcast %cst_98 : f32 to vector<6x6xf32>
    %237 = arith.addf %235, %236 : vector<6x6xf32>
    %cst_99 = arith.constant 2.000000e+00 : f32
    %238 = vector.broadcast %cst_99 : f32 to vector<6x6xf32>
    %239 = arith.mulf %238, %233 : vector<6x6xf32>
    %cst_100 = arith.constant 8.99999984E-4 : f32
    %240 = vector.broadcast %cst_100 : f32 to vector<6x6xf32>
    %241 = arith.addf %239, %240 : vector<6x6xf32>
    %242 = arith.mulf %237, %241 : vector<6x6xf32>
    %243 = arith.addf %228, %229 : vector<6x6xf32>
    %cst_101 = arith.constant 9.99999974E-5 : f32
    %244 = vector.broadcast %cst_101 : f32 to vector<6x6xf32>
    %245 = arith.addf %243, %244 : vector<6x6xf32>
    %246 = arith.addf %231, %232 : vector<6x6xf32>
    %cst_102 = arith.constant 8.99999984E-4 : f32
    %247 = vector.broadcast %cst_102 : f32 to vector<6x6xf32>
    %248 = arith.addf %246, %247 : vector<6x6xf32>
    %249 = arith.mulf %245, %248 : vector<6x6xf32>
    %250 = tpu.reciprocal %249 {approx = true} : vector<6x6xf32> -> vector<6x6xf32>
    %251 = arith.mulf %242, %250 : vector<6x6xf32>
    %252 = arith.addf %207, %251 : vector<6x6xf32>
    %253 = vector.extract_strided_slice %19 {offsets = [5, 0, 0], sizes = [1, 16, 16], strides = [1, 1, 1]} : vector<8x16x16xf32> to vector<1x16x16xf32>
    %254 = vector.shape_cast %253 : vector<1x16x16xf32> to vector<16x16xf32>
    %cst_103 = arith.constant dense<0.000000e+00> : vector<6x16xf32>
    %255 = tpu.matmul %27, %254, %cst_103 {dimension_numbers = #tpu.dot_dimension_numbers<[1], [0], [0], [1], [0, 0, 1, 1], [], []>} : vector<6x16xf32>, vector<16x16xf32>, vector<6x16xf32> -> vector<6x16xf32>
    %cst_104 = arith.constant dense<0.000000e+00> : vector<6x6xf32>
    %256 = tpu.matmul %255, %28, %cst_104 {dimension_numbers = #tpu.dot_dimension_numbers<[1], [0], [0], [1], [0, 0, 1, 1], [], []>} : vector<6x16xf32>, vector<16x6xf32>, vector<6x6xf32> -> vector<6x6xf32>
    %257 = vector.extract_strided_slice %23 {offsets = [5, 0, 0], sizes = [1, 16, 16], strides = [1, 1, 1]} : vector<8x16x16xf32> to vector<1x16x16xf32>
    %258 = vector.shape_cast %257 : vector<1x16x16xf32> to vector<16x16xf32>
    %cst_105 = arith.constant dense<0.000000e+00> : vector<6x16xf32>
    %259 = tpu.matmul %27, %258, %cst_105 {dimension_numbers = #tpu.dot_dimension_numbers<[1], [0], [0], [1], [0, 0, 1, 1], [], []>} : vector<6x16xf32>, vector<16x16xf32>, vector<6x16xf32> -> vector<6x16xf32>
    %cst_106 = arith.constant dense<0.000000e+00> : vector<6x6xf32>
    %260 = tpu.matmul %259, %28, %cst_106 {dimension_numbers = #tpu.dot_dimension_numbers<[1], [0], [0], [1], [0, 0, 1, 1], [], []>} : vector<6x16xf32>, vector<16x6xf32>, vector<6x6xf32> -> vector<6x6xf32>
    %261 = vector.extract_strided_slice %24 {offsets = [5, 0, 0], sizes = [1, 16, 16], strides = [1, 1, 1]} : vector<8x16x16xf32> to vector<1x16x16xf32>
    %262 = vector.shape_cast %261 : vector<1x16x16xf32> to vector<16x16xf32>
    %cst_107 = arith.constant dense<0.000000e+00> : vector<6x16xf32>
    %263 = tpu.matmul %27, %262, %cst_107 {dimension_numbers = #tpu.dot_dimension_numbers<[1], [0], [0], [1], [0, 0, 1, 1], [], []>} : vector<6x16xf32>, vector<16x16xf32>, vector<6x16xf32> -> vector<6x16xf32>
    %cst_108 = arith.constant dense<0.000000e+00> : vector<6x6xf32>
    %264 = tpu.matmul %263, %28, %cst_108 {dimension_numbers = #tpu.dot_dimension_numbers<[1], [0], [0], [1], [0, 0, 1, 1], [], []>} : vector<6x16xf32>, vector<16x6xf32>, vector<6x6xf32> -> vector<6x6xf32>
    %265 = vector.extract_strided_slice %25 {offsets = [5, 0, 0], sizes = [1, 16, 16], strides = [1, 1, 1]} : vector<8x16x16xf32> to vector<1x16x16xf32>
    %266 = vector.shape_cast %265 : vector<1x16x16xf32> to vector<16x16xf32>
    %cst_109 = arith.constant dense<0.000000e+00> : vector<6x16xf32>
    %267 = tpu.matmul %27, %266, %cst_109 {dimension_numbers = #tpu.dot_dimension_numbers<[1], [0], [0], [1], [0, 0, 1, 1], [], []>} : vector<6x16xf32>, vector<16x16xf32>, vector<6x16xf32> -> vector<6x16xf32>
    %cst_110 = arith.constant dense<0.000000e+00> : vector<6x6xf32>
    %268 = tpu.matmul %267, %28, %cst_110 {dimension_numbers = #tpu.dot_dimension_numbers<[1], [0], [0], [1], [0, 0, 1, 1], [], []>} : vector<6x16xf32>, vector<16x6xf32>, vector<6x6xf32> -> vector<6x6xf32>
    %269 = vector.extract_strided_slice %26 {offsets = [5, 0, 0], sizes = [1, 16, 16], strides = [1, 1, 1]} : vector<8x16x16xf32> to vector<1x16x16xf32>
    %270 = vector.shape_cast %269 : vector<1x16x16xf32> to vector<16x16xf32>
    %cst_111 = arith.constant dense<0.000000e+00> : vector<6x16xf32>
    %271 = tpu.matmul %27, %270, %cst_111 {dimension_numbers = #tpu.dot_dimension_numbers<[1], [0], [0], [1], [0, 0, 1, 1], [], []>} : vector<6x16xf32>, vector<16x16xf32>, vector<6x16xf32> -> vector<6x16xf32>
    %cst_112 = arith.constant dense<0.000000e+00> : vector<6x6xf32>
    %272 = tpu.matmul %271, %28, %cst_112 {dimension_numbers = #tpu.dot_dimension_numbers<[1], [0], [0], [1], [0, 0, 1, 1], [], []>} : vector<6x16xf32>, vector<16x6xf32>, vector<6x6xf32> -> vector<6x6xf32>
    %273 = arith.mulf %256, %256 : vector<6x6xf32>
    %274 = arith.mulf %260, %260 : vector<6x6xf32>
    %275 = arith.mulf %256, %260 : vector<6x6xf32>
    %276 = arith.subf %264, %273 : vector<6x6xf32>
    %277 = arith.subf %268, %274 : vector<6x6xf32>
    %278 = arith.subf %272, %275 : vector<6x6xf32>
    %cst_113 = arith.constant 2.000000e+00 : f32
    %279 = vector.broadcast %cst_113 : f32 to vector<6x6xf32>
    %280 = arith.mulf %279, %275 : vector<6x6xf32>
    %cst_114 = arith.constant 9.99999974E-5 : f32
    %281 = vector.broadcast %cst_114 : f32 to vector<6x6xf32>
    %282 = arith.addf %280, %281 : vector<6x6xf32>
    %cst_115 = arith.constant 2.000000e+00 : f32
    %283 = vector.broadcast %cst_115 : f32 to vector<6x6xf32>
    %284 = arith.mulf %283, %278 : vector<6x6xf32>
    %cst_116 = arith.constant 8.99999984E-4 : f32
    %285 = vector.broadcast %cst_116 : f32 to vector<6x6xf32>
    %286 = arith.addf %284, %285 : vector<6x6xf32>
    %287 = arith.mulf %282, %286 : vector<6x6xf32>
    %288 = arith.addf %273, %274 : vector<6x6xf32>
    %cst_117 = arith.constant 9.99999974E-5 : f32
    %289 = vector.broadcast %cst_117 : f32 to vector<6x6xf32>
    %290 = arith.addf %288, %289 : vector<6x6xf32>
    %291 = arith.addf %276, %277 : vector<6x6xf32>
    %cst_118 = arith.constant 8.99999984E-4 : f32
    %292 = vector.broadcast %cst_118 : f32 to vector<6x6xf32>
    %293 = arith.addf %291, %292 : vector<6x6xf32>
    %294 = arith.mulf %290, %293 : vector<6x6xf32>
    %295 = tpu.reciprocal %294 {approx = true} : vector<6x6xf32> -> vector<6x6xf32>
    %296 = arith.mulf %287, %295 : vector<6x6xf32>
    %297 = arith.addf %252, %296 : vector<6x6xf32>
    %298 = vector.extract_strided_slice %19 {offsets = [6, 0, 0], sizes = [1, 16, 16], strides = [1, 1, 1]} : vector<8x16x16xf32> to vector<1x16x16xf32>
    %299 = vector.shape_cast %298 : vector<1x16x16xf32> to vector<16x16xf32>
    %cst_119 = arith.constant dense<0.000000e+00> : vector<6x16xf32>
    %300 = tpu.matmul %27, %299, %cst_119 {dimension_numbers = #tpu.dot_dimension_numbers<[1], [0], [0], [1], [0, 0, 1, 1], [], []>} : vector<6x16xf32>, vector<16x16xf32>, vector<6x16xf32> -> vector<6x16xf32>
    %cst_120 = arith.constant dense<0.000000e+00> : vector<6x6xf32>
    %301 = tpu.matmul %300, %28, %cst_120 {dimension_numbers = #tpu.dot_dimension_numbers<[1], [0], [0], [1], [0, 0, 1, 1], [], []>} : vector<6x16xf32>, vector<16x6xf32>, vector<6x6xf32> -> vector<6x6xf32>
    %302 = vector.extract_strided_slice %23 {offsets = [6, 0, 0], sizes = [1, 16, 16], strides = [1, 1, 1]} : vector<8x16x16xf32> to vector<1x16x16xf32>
    %303 = vector.shape_cast %302 : vector<1x16x16xf32> to vector<16x16xf32>
    %cst_121 = arith.constant dense<0.000000e+00> : vector<6x16xf32>
    %304 = tpu.matmul %27, %303, %cst_121 {dimension_numbers = #tpu.dot_dimension_numbers<[1], [0], [0], [1], [0, 0, 1, 1], [], []>} : vector<6x16xf32>, vector<16x16xf32>, vector<6x16xf32> -> vector<6x16xf32>
    %cst_122 = arith.constant dense<0.000000e+00> : vector<6x6xf32>
    %305 = tpu.matmul %304, %28, %cst_122 {dimension_numbers = #tpu.dot_dimension_numbers<[1], [0], [0], [1], [0, 0, 1, 1], [], []>} : vector<6x16xf32>, vector<16x6xf32>, vector<6x6xf32> -> vector<6x6xf32>
    %306 = vector.extract_strided_slice %24 {offsets = [6, 0, 0], sizes = [1, 16, 16], strides = [1, 1, 1]} : vector<8x16x16xf32> to vector<1x16x16xf32>
    %307 = vector.shape_cast %306 : vector<1x16x16xf32> to vector<16x16xf32>
    %cst_123 = arith.constant dense<0.000000e+00> : vector<6x16xf32>
    %308 = tpu.matmul %27, %307, %cst_123 {dimension_numbers = #tpu.dot_dimension_numbers<[1], [0], [0], [1], [0, 0, 1, 1], [], []>} : vector<6x16xf32>, vector<16x16xf32>, vector<6x16xf32> -> vector<6x16xf32>
    %cst_124 = arith.constant dense<0.000000e+00> : vector<6x6xf32>
    %309 = tpu.matmul %308, %28, %cst_124 {dimension_numbers = #tpu.dot_dimension_numbers<[1], [0], [0], [1], [0, 0, 1, 1], [], []>} : vector<6x16xf32>, vector<16x6xf32>, vector<6x6xf32> -> vector<6x6xf32>
    %310 = vector.extract_strided_slice %25 {offsets = [6, 0, 0], sizes = [1, 16, 16], strides = [1, 1, 1]} : vector<8x16x16xf32> to vector<1x16x16xf32>
    %311 = vector.shape_cast %310 : vector<1x16x16xf32> to vector<16x16xf32>
    %cst_125 = arith.constant dense<0.000000e+00> : vector<6x16xf32>
    %312 = tpu.matmul %27, %311, %cst_125 {dimension_numbers = #tpu.dot_dimension_numbers<[1], [0], [0], [1], [0, 0, 1, 1], [], []>} : vector<6x16xf32>, vector<16x16xf32>, vector<6x16xf32> -> vector<6x16xf32>
    %cst_126 = arith.constant dense<0.000000e+00> : vector<6x6xf32>
    %313 = tpu.matmul %312, %28, %cst_126 {dimension_numbers = #tpu.dot_dimension_numbers<[1], [0], [0], [1], [0, 0, 1, 1], [], []>} : vector<6x16xf32>, vector<16x6xf32>, vector<6x6xf32> -> vector<6x6xf32>
    %314 = vector.extract_strided_slice %26 {offsets = [6, 0, 0], sizes = [1, 16, 16], strides = [1, 1, 1]} : vector<8x16x16xf32> to vector<1x16x16xf32>
    %315 = vector.shape_cast %314 : vector<1x16x16xf32> to vector<16x16xf32>
    %cst_127 = arith.constant dense<0.000000e+00> : vector<6x16xf32>
    %316 = tpu.matmul %27, %315, %cst_127 {dimension_numbers = #tpu.dot_dimension_numbers<[1], [0], [0], [1], [0, 0, 1, 1], [], []>} : vector<6x16xf32>, vector<16x16xf32>, vector<6x16xf32> -> vector<6x16xf32>
    %cst_128 = arith.constant dense<0.000000e+00> : vector<6x6xf32>
    %317 = tpu.matmul %316, %28, %cst_128 {dimension_numbers = #tpu.dot_dimension_numbers<[1], [0], [0], [1], [0, 0, 1, 1], [], []>} : vector<6x16xf32>, vector<16x6xf32>, vector<6x6xf32> -> vector<6x6xf32>
    %318 = arith.mulf %301, %301 : vector<6x6xf32>
    %319 = arith.mulf %305, %305 : vector<6x6xf32>
    %320 = arith.mulf %301, %305 : vector<6x6xf32>
    %321 = arith.subf %309, %318 : vector<6x6xf32>
    %322 = arith.subf %313, %319 : vector<6x6xf32>
    %323 = arith.subf %317, %320 : vector<6x6xf32>
    %cst_129 = arith.constant 2.000000e+00 : f32
    %324 = vector.broadcast %cst_129 : f32 to vector<6x6xf32>
    %325 = arith.mulf %324, %320 : vector<6x6xf32>
    %cst_130 = arith.constant 9.99999974E-5 : f32
    %326 = vector.broadcast %cst_130 : f32 to vector<6x6xf32>
    %327 = arith.addf %325, %326 : vector<6x6xf32>
    %cst_131 = arith.constant 2.000000e+00 : f32
    %328 = vector.broadcast %cst_131 : f32 to vector<6x6xf32>
    %329 = arith.mulf %328, %323 : vector<6x6xf32>
    %cst_132 = arith.constant 8.99999984E-4 : f32
    %330 = vector.broadcast %cst_132 : f32 to vector<6x6xf32>
    %331 = arith.addf %329, %330 : vector<6x6xf32>
    %332 = arith.mulf %327, %331 : vector<6x6xf32>
    %333 = arith.addf %318, %319 : vector<6x6xf32>
    %cst_133 = arith.constant 9.99999974E-5 : f32
    %334 = vector.broadcast %cst_133 : f32 to vector<6x6xf32>
    %335 = arith.addf %333, %334 : vector<6x6xf32>
    %336 = arith.addf %321, %322 : vector<6x6xf32>
    %cst_134 = arith.constant 8.99999984E-4 : f32
    %337 = vector.broadcast %cst_134 : f32 to vector<6x6xf32>
    %338 = arith.addf %336, %337 : vector<6x6xf32>
    %339 = arith.mulf %335, %338 : vector<6x6xf32>
    %340 = tpu.reciprocal %339 {approx = true} : vector<6x6xf32> -> vector<6x6xf32>
    %341 = arith.mulf %332, %340 : vector<6x6xf32>
    %342 = arith.addf %297, %341 : vector<6x6xf32>
    %343 = vector.extract_strided_slice %19 {offsets = [7, 0, 0], sizes = [1, 16, 16], strides = [1, 1, 1]} : vector<8x16x16xf32> to vector<1x16x16xf32>
    %344 = vector.shape_cast %343 : vector<1x16x16xf32> to vector<16x16xf32>
    %cst_135 = arith.constant dense<0.000000e+00> : vector<6x16xf32>
    %345 = tpu.matmul %27, %344, %cst_135 {dimension_numbers = #tpu.dot_dimension_numbers<[1], [0], [0], [1], [0, 0, 1, 1], [], []>} : vector<6x16xf32>, vector<16x16xf32>, vector<6x16xf32> -> vector<6x16xf32>
    %cst_136 = arith.constant dense<0.000000e+00> : vector<6x6xf32>
    %346 = tpu.matmul %345, %28, %cst_136 {dimension_numbers = #tpu.dot_dimension_numbers<[1], [0], [0], [1], [0, 0, 1, 1], [], []>} : vector<6x16xf32>, vector<16x6xf32>, vector<6x6xf32> -> vector<6x6xf32>
    %347 = vector.extract_strided_slice %23 {offsets = [7, 0, 0], sizes = [1, 16, 16], strides = [1, 1, 1]} : vector<8x16x16xf32> to vector<1x16x16xf32>
    %348 = vector.shape_cast %347 : vector<1x16x16xf32> to vector<16x16xf32>
    %cst_137 = arith.constant dense<0.000000e+00> : vector<6x16xf32>
    %349 = tpu.matmul %27, %348, %cst_137 {dimension_numbers = #tpu.dot_dimension_numbers<[1], [0], [0], [1], [0, 0, 1, 1], [], []>} : vector<6x16xf32>, vector<16x16xf32>, vector<6x16xf32> -> vector<6x16xf32>
    %cst_138 = arith.constant dense<0.000000e+00> : vector<6x6xf32>
    %350 = tpu.matmul %349, %28, %cst_138 {dimension_numbers = #tpu.dot_dimension_numbers<[1], [0], [0], [1], [0, 0, 1, 1], [], []>} : vector<6x16xf32>, vector<16x6xf32>, vector<6x6xf32> -> vector<6x6xf32>
    %351 = vector.extract_strided_slice %24 {offsets = [7, 0, 0], sizes = [1, 16, 16], strides = [1, 1, 1]} : vector<8x16x16xf32> to vector<1x16x16xf32>
    %352 = vector.shape_cast %351 : vector<1x16x16xf32> to vector<16x16xf32>
    %cst_139 = arith.constant dense<0.000000e+00> : vector<6x16xf32>
    %353 = tpu.matmul %27, %352, %cst_139 {dimension_numbers = #tpu.dot_dimension_numbers<[1], [0], [0], [1], [0, 0, 1, 1], [], []>} : vector<6x16xf32>, vector<16x16xf32>, vector<6x16xf32> -> vector<6x16xf32>
    %cst_140 = arith.constant dense<0.000000e+00> : vector<6x6xf32>
    %354 = tpu.matmul %353, %28, %cst_140 {dimension_numbers = #tpu.dot_dimension_numbers<[1], [0], [0], [1], [0, 0, 1, 1], [], []>} : vector<6x16xf32>, vector<16x6xf32>, vector<6x6xf32> -> vector<6x6xf32>
    %355 = vector.extract_strided_slice %25 {offsets = [7, 0, 0], sizes = [1, 16, 16], strides = [1, 1, 1]} : vector<8x16x16xf32> to vector<1x16x16xf32>
    %356 = vector.shape_cast %355 : vector<1x16x16xf32> to vector<16x16xf32>
    %cst_141 = arith.constant dense<0.000000e+00> : vector<6x16xf32>
    %357 = tpu.matmul %27, %356, %cst_141 {dimension_numbers = #tpu.dot_dimension_numbers<[1], [0], [0], [1], [0, 0, 1, 1], [], []>} : vector<6x16xf32>, vector<16x16xf32>, vector<6x16xf32> -> vector<6x16xf32>
    %cst_142 = arith.constant dense<0.000000e+00> : vector<6x6xf32>
    %358 = tpu.matmul %357, %28, %cst_142 {dimension_numbers = #tpu.dot_dimension_numbers<[1], [0], [0], [1], [0, 0, 1, 1], [], []>} : vector<6x16xf32>, vector<16x6xf32>, vector<6x6xf32> -> vector<6x6xf32>
    %359 = vector.extract_strided_slice %26 {offsets = [7, 0, 0], sizes = [1, 16, 16], strides = [1, 1, 1]} : vector<8x16x16xf32> to vector<1x16x16xf32>
    %360 = vector.shape_cast %359 : vector<1x16x16xf32> to vector<16x16xf32>
    %cst_143 = arith.constant dense<0.000000e+00> : vector<6x16xf32>
    %361 = tpu.matmul %27, %360, %cst_143 {dimension_numbers = #tpu.dot_dimension_numbers<[1], [0], [0], [1], [0, 0, 1, 1], [], []>} : vector<6x16xf32>, vector<16x16xf32>, vector<6x16xf32> -> vector<6x16xf32>
    %cst_144 = arith.constant dense<0.000000e+00> : vector<6x6xf32>
    %362 = tpu.matmul %361, %28, %cst_144 {dimension_numbers = #tpu.dot_dimension_numbers<[1], [0], [0], [1], [0, 0, 1, 1], [], []>} : vector<6x16xf32>, vector<16x6xf32>, vector<6x6xf32> -> vector<6x6xf32>
    %363 = arith.mulf %346, %346 : vector<6x6xf32>
    %364 = arith.mulf %350, %350 : vector<6x6xf32>
    %365 = arith.mulf %346, %350 : vector<6x6xf32>
    %366 = arith.subf %354, %363 : vector<6x6xf32>
    %367 = arith.subf %358, %364 : vector<6x6xf32>
    %368 = arith.subf %362, %365 : vector<6x6xf32>
    %cst_145 = arith.constant 2.000000e+00 : f32
    %369 = vector.broadcast %cst_145 : f32 to vector<6x6xf32>
    %370 = arith.mulf %369, %365 : vector<6x6xf32>
    %cst_146 = arith.constant 9.99999974E-5 : f32
    %371 = vector.broadcast %cst_146 : f32 to vector<6x6xf32>
    %372 = arith.addf %370, %371 : vector<6x6xf32>
    %cst_147 = arith.constant 2.000000e+00 : f32
    %373 = vector.broadcast %cst_147 : f32 to vector<6x6xf32>
    %374 = arith.mulf %373, %368 : vector<6x6xf32>
    %cst_148 = arith.constant 8.99999984E-4 : f32
    %375 = vector.broadcast %cst_148 : f32 to vector<6x6xf32>
    %376 = arith.addf %374, %375 : vector<6x6xf32>
    %377 = arith.mulf %372, %376 : vector<6x6xf32>
    %378 = arith.addf %363, %364 : vector<6x6xf32>
    %cst_149 = arith.constant 9.99999974E-5 : f32
    %379 = vector.broadcast %cst_149 : f32 to vector<6x6xf32>
    %380 = arith.addf %378, %379 : vector<6x6xf32>
    %381 = arith.addf %366, %367 : vector<6x6xf32>
    %cst_150 = arith.constant 8.99999984E-4 : f32
    %382 = vector.broadcast %cst_150 : f32 to vector<6x6xf32>
    %383 = arith.addf %381, %382 : vector<6x6xf32>
    %384 = arith.mulf %380, %383 : vector<6x6xf32>
    %385 = tpu.reciprocal %384 {approx = true} : vector<6x6xf32> -> vector<6x6xf32>
    %386 = arith.mulf %377, %385 : vector<6x6xf32>
    %387 = arith.addf %342, %386 : vector<6x6xf32>
    %c0_151 = arith.constant 0 : index
    %c0_152 = arith.constant 0 : index
    %388 = vector.load %arg11[%c0_151, %c0_152] : memref<6x6xf32, #tpu.memory_space<vmem>>, vector<6x6xf32>
    %389 = arith.addf %388, %387 : vector<6x6xf32>
    %c0_153 = arith.constant 0 : index
    %c0_154 = arith.constant 0 : index
    %390 = vector.load %arg11[%c0_153, %c0_154] : memref<6x6xf32, #tpu.memory_space<vmem>>, vector<6x6xf32>
    tpu.vector_store %arg11[%c0_153, %c0_154], %389 {strides = array<i32>} : memref<6x6xf32, #tpu.memory_space<vmem>>, vector<6x6xf32>,
    %c0_i32_155 = arith.constant 0 : i32
    %391 = arith.cmpi eq, %arg1, %c0_i32_155 : i32
    %392 = arith.extui %391 : i1 to i32
    %c0_i32_156 = arith.constant 0 : i32
    %393 = arith.cmpi ne, %392, %c0_i32_156 : i32
    scf.if %393 {
      %c0_157 = arith.constant 0 : index
      %c0_158 = arith.constant 0 : index
      %394 = vector.load %arg9[%c0_157, %c0_158] : memref<16x16xf32, #tpu.memory_space<vmem>>, vector<16x16xf32>
      %395 = vector.shape_cast %394 : vector<16x16xf32> to vector<1x16x16xf32>
      %cst_159 = arith.constant dense<0.000000e+00> : vector<1xf32>
      %396 = vector.multi_reduction <add>, %395, %cst_159 [1, 2] : vector<1x16x16xf32> to vector<1xf32>
      %397 = vector.shape_cast %396 : vector<1xf32> to vector<1x1x1xf32>
      %398 = vector.extract %397[0, 0, 0] : f32 from vector<1x1x1xf32>
      %399 = vector.broadcast %398 : f32 to vector<1x1xf32>
      %c0_160 = arith.constant 0 : index
      %c0_161 = arith.constant 0 : index
      %c0_162 = arith.constant 0 : index
      %400 = vector.load %arg6[%c0_160, %c0_161, %c0_162] : memref<1x1x1xf32, #tpu.memory_space<vmem>>, vector<1x1x1xf32>
      %401 = vector.shape_cast %400 : vector<1x1x1xf32> to vector<1x1xf32>
      %402 = vector.shape_cast %399 : vector<1x1xf32> to vector<1x1x1xf32>
      tpu.vector_store %arg6[%c0_160, %c0_161, %c0_162], %402 {strides = array<i32>} : memref<1x1x1xf32, #tpu.memory_space<vmem>>, vector<1x1x1xf32>,
      %c0_163 = arith.constant 0 : index
      %c0_164 = arith.constant 0 : index
      %403 = vector.load %arg10[%c0_163, %c0_164] : memref<16x16xf32, #tpu.memory_space<vmem>>, vector<16x16xf32>
      %404 = vector.shape_cast %403 : vector<16x16xf32> to vector<1x16x16xf32>
      %cst_165 = arith.constant dense<0.000000e+00> : vector<1xf32>
      %405 = vector.multi_reduction <add>, %404, %cst_165 [1, 2] : vector<1x16x16xf32> to vector<1xf32>
      %406 = vector.shape_cast %405 : vector<1xf32> to vector<1x1x1xf32>
      %407 = vector.extract %406[0, 0, 0] : f32 from vector<1x1x1xf32>
      %408 = vector.broadcast %407 : f32 to vector<1x1xf32>
      %c0_166 = arith.constant 0 : index
      %c0_167 = arith.constant 0 : index
      %c0_168 = arith.constant 0 : index
      %409 = vector.load %arg7[%c0_166, %c0_167, %c0_168] : memref<1x1x1xf32, #tpu.memory_space<vmem>>, vector<1x1x1xf32>
      %410 = vector.shape_cast %409 : vector<1x1x1xf32> to vector<1x1xf32>
      %411 = vector.shape_cast %408 : vector<1x1xf32> to vector<1x1x1xf32>
      tpu.vector_store %arg7[%c0_166, %c0_167, %c0_168], %411 {strides = array<i32>} : memref<1x1x1xf32, #tpu.memory_space<vmem>>, vector<1x1x1xf32>,
      %c0_169 = arith.constant 0 : index
      %c0_170 = arith.constant 0 : index
      %412 = vector.load %arg11[%c0_169, %c0_170] : memref<6x6xf32, #tpu.memory_space<vmem>>, vector<6x6xf32>
      %413 = vector.shape_cast %412 : vector<6x6xf32> to vector<1x6x6xf32>
      %cst_171 = arith.constant dense<0.000000e+00> : vector<1xf32>
      %414 = vector.multi_reduction <add>, %413, %cst_171 [1, 2] : vector<1x6x6xf32> to vector<1xf32>
      %415 = vector.shape_cast %414 : vector<1xf32> to vector<1x1x1xf32>
      %416 = vector.extract %415[0, 0, 0] : f32 from vector<1x1x1xf32>
      %417 = vector.broadcast %416 : f32 to vector<1x1xf32>
      %c0_172 = arith.constant 0 : index
      %c0_173 = arith.constant 0 : index
      %c0_174 = arith.constant 0 : index
      %418 = vector.load %arg8[%c0_172, %c0_173, %c0_174] : memref<1x1x1xf32, #tpu.memory_space<vmem>>, vector<1x1x1xf32>
      %419 = vector.shape_cast %418 : vector<1x1x1xf32> to vector<1x1xf32>
      %420 = vector.shape_cast %417 : vector<1x1xf32> to vector<1x1x1xf32>
      tpu.vector_store %arg8[%c0_172, %c0_173, %c0_174], %420 {strides = array<i32>} : memref<1x1x1xf32, #tpu.memory_space<vmem>>, vector<1x1x1xf32>,
    } else {
    }
    return
  }
  func.func @transform_0(%arg0: i32, %arg1: i32) -> (i32, i32, i32) {
    %c1_i32 = arith.constant 1 : i32
    %0 = arith.muli %arg0, %c1_i32 : i32
    %1 = arith.addi %0, %arg1 : i32
    %c0_i32 = arith.constant 0 : i32
    %c0_i32_0 = arith.constant 0 : i32
    %c0_i32_1 = arith.constant 0 : i32
    return %1, %c0_i32, %c0_i32_0 : i32, i32, i32
  }
  func.func @transform_1(%arg0: i32, %arg1: i32) -> (i32, i32, i32) {
    %c1_i32 = arith.constant 1 : i32
    %0 = arith.muli %arg0, %c1_i32 : i32
    %1 = arith.addi %0, %arg1 : i32
    %c0_i32 = arith.constant 0 : i32
    %c0_i32_0 = arith.constant 0 : i32
    %c0_i32_1 = arith.constant 0 : i32
    return %1, %c0_i32, %c0_i32_0 : i32, i32, i32
  }
  func.func @transform_2(%arg0: i32, %arg1: i32) -> (i32, i32) {
    %c0_i32 = arith.constant 0 : i32
    %c0_i32_0 = arith.constant 0 : i32
    %c0_i32_1 = arith.constant 0 : i32
    return %c0_i32, %c0_i32_0 : i32, i32
  }
  func.func @transform_3(%arg0: i32, %arg1: i32) -> (i32, i32) {
    %c0_i32 = arith.constant 0 : i32
    %c0_i32_0 = arith.constant 0 : i32
    %c0_i32_1 = arith.constant 0 : i32
    return %c0_i32, %c0_i32_0 : i32, i32
  }
  func.func @transform_4(%arg0: i32, %arg1: i32) -> (i32, i32, i32) {
    %c0_i32 = arith.constant 0 : i32
    %c0_i32_0 = arith.constant 0 : i32
    %c0_i32_1 = arith.constant 0 : i32
    return %arg0, %c0_i32, %c0_i32_0 : i32, i32, i32
  }
  func.func @transform_5(%arg0: i32, %arg1: i32) -> (i32, i32, i32) {
    %c0_i32 = arith.constant 0 : i32
    %c0_i32_0 = arith.constant 0 : i32
    %c0_i32_1 = arith.constant 0 : i32
    return %arg0, %c0_i32, %c0_i32_0 : i32, i32, i32
  }
  func.func @transform_6(%arg0: i32, %arg1: i32) -> (i32, i32, i32) {
    %c0_i32 = arith.constant 0 : i32
    %c0_i32_0 = arith.constant 0 : i32
    %c0_i32_1 = arith.constant 0 : i32
    return %arg0, %c0_i32, %c0_i32_0 : i32, i32, i32
  }
}

</mosaic_0001>

<bundles_post_ra>
// kernel: combined_loss.1
= control target key start
LH: loop header
LB: loop body
LE: loop exit
PB: predicated region body
PF: predicated region fallthrough
CT: control target
= control target key end

     0   :  { %12 = vsyncpa [#allocation6], 0  ;;  %vm76_vm0 = vcmask 130048   ;;  %v7549_v2 = vmov 0.0|0.0   ;;  %v7550_v5 = vmov 0.0   ;;  %vm7551_vm1 = vmmov 0   ;;  %s8440_s0 = inlined_call_operand.vmem [shape: f32[8,16,16], index: 0, kind: input, shape index: {}]   ;;  %s8441_s1 = inlined_call_operand.vmem [shape: f32[8,16,16], index: 1, kind: input, shape index: {}]   ;;  %s8442_s2 = inlined_call_operand.vmem [shape: f32[6,16], index: 2, kind: input, shape index: {}]   ;;  %s8443_s3 = inlined_call_operand.vmem [shape: f32[16,6], index: 3, kind: input, shape index: {}]   ;;  %s8444_s4 = inlined_call_operand.hbm [shape: f32[1,1,1], index: 4, kind: output, shape index: {0}]   ;;  %s8445_s5 = inlined_call_operand.hbm [shape: f32[1,1,1], index: 5, kind: output, shape index: {1}]   ;;  %s8446_s6 = inlined_call_operand.hbm [shape: f32[1,1,1], index: 6, kind: output, shape index: {2}]  }
   0x1   :  { %v83_v0 = vld [vmem:[%s8440_s0] sm:$0xff]  ;;  %v84_v1 = vld [vmem:[%s8440_s0 + $0x8] sm:$0xff]  ;;  %7211 = vmatprep.subr.bf16.mxu0 %v7549_v2  ;;  %77 = vst.msk [vmem:[#allocation2] sm:$0xff] %vm76_vm0, %v7550_v5  ;;  %78 = vst.msk [vmem:[#allocation2 + $0x8] sm:$0xff] %vm76_vm0, %v7550_v5  ;;  %7214 = vmatprep.subr.bf16.mxu1 %v7549_v2 }
   0x2   :  { %v236_v3 = vadd.f32 1.0, %v83_v0  ;;  %v237_v4 = vadd.f32 1.0, %v84_v1  ;;  %79 = vst.msk [vmem:[#allocation3] sm:$0xff] %vm76_vm0, %v7550_v5  ;;  %80 = vst.msk [vmem:[#allocation3 + $0x8] sm:$0xff] %vm76_vm0, %v7550_v5  ;;  %v99_v6 = vld [vmem:[%s8441_s1] sm:$0xff]  ;;  %v100_v7 = vld [vmem:[%s8441_s1 + $0x8] sm:$0xff]  ;;  %6655 = vmatprep.mubr.msk.f32.mxu0 %vm7551_vm1, %v7550_v5  ;;  %6662 = vmatprep.mubr.msk.f32.mxu1 %vm7551_vm1, %v7550_v5 }
   0x3   :  { %v268_v10 = vadd.f32 1.0, %v99_v6  ;;  %v269_v11 = vadd.f32 1.0, %v100_v7  ;;  %v7619_v15 = vld [vmem:[%s8442_s2] sm:$0x3f] }
   0x4   :  { %v252_v8 = vmul.f32 0.5, %v236_v3  ;;  %v253_v9 = vmul.f32 0.5, %v237_v4 }
   0x5   :  { %v284_v12 = vmul.f32 0.5, %v268_v10  ;;  %v285_v13 = vmul.f32 0.5, %v269_v11 }
   0x6   :  { %v7212_v14 = vpack.c.bf16 %v253_v9, %v252_v8  ;;  %v300_v17 = vmul.f32 %v252_v8, %v252_v8  ;;  %v301_v18 = vmul.f32 %v253_v9, %v253_v9 }
   0x7   :  { %v7218_v16 = vpack.c.bf16 %v285_v13, %v284_v12 }
   0x8   :  { %7213 = vmatpush3.bf16.msra.mxu0 %v7212_v14 }
   0x9   :  { %13 = vsyncpa [#allocation8], 0  ;;  %7217 = vmatprep.subr.bf16.mxu0 %v7549_v2  ;;  %v85_v19 = vld [vmem:[%s8440_s0 + $0x10] sm:$0xff]  ;;  %v115_v21 = vsub.f32 %v83_v0, %v99_v6  ;;  %v116_v22 = vsub.f32 %v84_v1, %v100_v7  ;;  %v86_v24 = vld [vmem:[%s8440_s0 + $0x18] sm:$0xff]  ;;  %v7224_v26 = vpack.c.bf16 %v301_v18, %v300_v17  ;;  %v316_v27 = vmul.f32 %v284_v12, %v284_v12  ;;  %s7552_s15 = smov [#allocation7]   ;;  %s7553_s17 = smov [#allocation5]  }
   0xa   :  { %v101_v20 = vld [vmem:[%s8441_s1 + $0x10] sm:$0xff]  ;;  %v102_v25 = vld [vmem:[%s8441_s1 + $0x18] sm:$0xff]  ;;  %v317_v28 = vmul.f32 %v285_v13, %v285_v13  ;;  %v238_v33 = vadd.f32 1.0, %v85_v19  ;;  %v239_v34 = vadd.f32 1.0, %v86_v24  ;;  %v332_v36 = vmul.f32 %v284_v12, %v252_v8  ;;  %v87_v44 = vld [vmem:[%s8440_s0 + $0x20] sm:$0xff]  ;;  %s6294_s16 = sshll.u32 %s7552_s15, 4  ;;  %s6295_s16 = int_to_ptr.vmem [resolvable:$true] %s6294_s16 }
   0xb   :  { %v117_v23 = vsub.f32 %v85_v19, %v101_v20  ;;  %6656 = vmatmul.mubr.msk.f32.vlgmr.msra.gmra.mrb[0].mxu0 %vm76_vm0, %v7619_v15  ;;  %v118_v29 = vsub.f32 %v86_v24, %v102_v25  ;;  %v133_v30 = vmul.f32 %v115_v21, %v115_v21  ;;  %v134_v31 = vmul.f32 %v116_v22, %v116_v22  ;;  %v88_v49 = vld [vmem:[%s8440_s0 + $0x28] sm:$0xff]  ;;  %v103_v50 = vld [vmem:[%s8441_s1 + $0x20] sm:$0xff]  ;;  %v89_v19 = vld [vmem:[%s8440_s0 + $0x30] sm:$0xff]  ;;  %s6284_s18 = sshll.u32 %s7553_s17, 4  ;;  %s7479_s19 = scalar_lea.vmem %s6295_s16, 16  ;;  %s6285_s18 = int_to_ptr.vmem [resolvable:$true] %s6284_s18 }
   0xc   :  { %7219 = vmatpush3.bf16.msra.mxu0 %v7218_v16  ;;  %6669 = vmatprep.mubr.msk.f32.mxu0 %vm7551_vm1, %v7550_v5  ;;  %v7230_v35 = vpack.c.bf16 %v317_v28, %v316_v27  ;;  %v333_v37 = vmul.f32 %v285_v13, %v253_v9  ;;  %v186_v39 = vand.u32 2147483647, %v115_v21  ;;  %v187_v40 = vand.u32 2147483647, %v116_v22  ;;  %v104_v54 = vld [vmem:[%s8441_s1 + $0x28] sm:$0xff]  ;;  %v90_v24 = vld [vmem:[%s8440_s0 + $0x38] sm:$0xff]  ;;  %p7480_p0 = scmp.ne.s32.totalorder %s6295_s16, %s7479_s19  ;;  %p7484_p1 = scmp.lt.s32.totalorder %s6295_s16, %s6295_s16 }
   0xd   :  { %7223 = vmatprep.subr.bf16.mxu0 %v7549_v2  ;;  %v135_v32 = vmul.f32 %v117_v23, %v117_v23  ;;  %v136_v38 = vmul.f32 %v118_v29, %v118_v29  ;;  %v188_v41 = vand.u32 2147483647, %v117_v23  ;;  %v189_v42 = vand.u32 2147483647, %v118_v29  ;;  %s7483_s20 = scalar_lea.vmem %s6295_s16, 32 }
   0xe   :  { %v270_v43 = vadd.f32 1.0, %v101_v20  ;;  %v150_v45 = vsel %vm76_vm0, %v133_v30, 0.0  ;;  %v254_v46 = vmul.f32 0.5, %v238_v33  ;;  %v255_v47 = vmul.f32 0.5, %v239_v34  ;;  %v7696_v20 = vld [vmem:[%s8441_s1 + $0x30] sm:$0xff]  ;;  %p7485_p2 = scmp.lt.s32.totalorder %s7483_s20, %s7479_s19 }
   0xf   :  { %6670 = vmatmul.mubr.msk.f32.vlgmr.msra.gmra.mrb[2].mxu0 %vm76_vm0, %v7619_v15  ;;  %v271_v48 = vadd.f32 1.0, %v102_v25  ;;  %v151_v51 = vsel %vm76_vm0, %v135_v32, 0.0  ;;  %v165_v52 = vsel %vm76_vm0, %v134_v31, 0.0  ;;  %v7236_v53 = vpack.c.bf16 %v333_v37, %v332_v36  ;;  %v7706_v25 = vld [vmem:[%s8441_s1 + $0x38] sm:$0xff] }
  0x10   :  { %7225 = vmatpush3.bf16.msra.mxu0 %v7224_v26  ;;  %6683 = vmatprep.mubr.msk.f32.mxu0 %vm7551_vm1, %v7550_v5  ;;  %v119_v55 = vsub.f32 %v87_v44, %v103_v50  ;;  %v166_v56 = vsel %vm76_vm0, %v136_v38, 0.0  ;;  %v202_v57 = vsel %vm76_vm0, %v186_v39, 0.0  ;;  %v217_v58 = vsel %vm76_vm0, %v187_v40, 0.0  ;;  %v7728_v39 = vld [vmem:[%s8440_s0 + $0x40] sm:$0xff]  ;;  %p7486_p3 = por %p7485_p2, %p7484_p1 }
  0x11   :  { %7229 = vmatprep.subr.bf16.mxu0 %v7549_v2  ;;  %v120_v59 = vsub.f32 %v88_v49, %v104_v54  ;;  %v203_v60 = vsel %vm76_vm0, %v188_v41, 0.0  ;;  %v286_v61 = vmul.f32 0.5, %v270_v43  ;;  %v240_v62 = vadd.f32 1.0, %v87_v44  ;;  %v7733_v40 = vld [vmem:[%s8441_s1 + $0x40] sm:$0xff] }
  0x12   :  { %v241_v63 = vadd.f32 1.0, %v88_v49  ;;  %v152_v0 = vadd.f32 %v151_v51, %v150_v45  ;;  %v7242_v1 = vpack.c.bf16 %v255_v47, %v254_v46  ;;  %v287_v3 = vmul.f32 0.5, %v271_v48  ;;  %v7744_v49 = vld [vmem:[%s8440_s0 + $0x48] sm:$0xff]  ;;  %p7487_p4 = pnand %p7486_p3, %p7480_p0 }
  0x13   :  { %6684 = vmatmul.mubr.msk.f32.vlgmr.msra.gmra.mrb[4].mxu0 %vm76_vm0, %v7619_v15  ;;  %v7670_v4 = vmul.f32 %v254_v46, %v254_v46  ;;  %v218_v6 = vsel %vm76_vm0, %v189_v42, 0.0  ;;  %v7675_v7 = vmul.f32 %v255_v47, %v255_v47  ;;  %v7677_v8 = vmul.f32 %v286_v61, %v286_v61 }
  0x14   :  { %7231 = vmatpush3.bf16.msra.mxu0 %v7230_v35  ;;  %6697 = vmatprep.mubr.msk.f32.mxu0 %vm7551_vm1, %v7550_v5  ;;  %v137_v9 = vmul.f32 %v119_v55, %v119_v55  ;;  %v7680_v10 = vmul.f32 %v287_v3, %v287_v3  ;;  %v7682_v11 = vmul.f32 %v286_v61, %v254_v46  ;;  %v190_v13 = vand.u32 2147483647, %v119_v55 }
  0x15   :  { %7235 = vmatprep.subr.bf16.mxu0 %v7549_v2  ;;  %v138_v12 = vmul.f32 %v120_v59, %v120_v59  ;;  %v7684_v14 = vmul.f32 %v287_v3, %v255_v47  ;;  %v7686_v16 = vmul.f32 0.5, %v240_v62  ;;  %v7688_v17 = vmul.f32 0.5, %v241_v63 }
  0x16   :  { %v191_v18 = vand.u32 2147483647, %v120_v59  ;;  %v167_v21 = vadd.f32 %v166_v56, %v165_v52  ;;  %v204_v22 = vadd.f32 %v203_v60, %v202_v57  ;;  %v219_v23 = vadd.f32 %v218_v6, %v217_v58  ;;  %v7791_v6 = vld [vmem:[%s8441_s1 + $0x50] sm:$0xff] }
  0x17   :  { %6698 = vmatmul.mubr.msk.f32.vlgmr.msra.gmra.mrb[6].mxu0 %vm76_vm0, %v7619_v15  ;;  %v121_v26 = vsub.f32 %v89_v19, %v7696_v20  ;;  %v7248_v27 = vpack.c.bf16 %v287_v3, %v286_v61  ;;  %v7254_v28 = vpack.c.bf16 %v7675_v7, %v7670_v4  ;;  %v153_v29 = vsel %vm76_vm0, %v137_v9, 0.0  ;;  %v7786_v4 = vld [vmem:[%s8440_s0 + $0x50] sm:$0xff] }
  0x18   :  { %7237 = vmatpush3.bf16.msra.mxu0 %v7236_v53  ;;  %6711 = vmatprep.mubr.msk.f32.mxu0 %vm7551_vm1, %v7550_v5  ;;  %v122_v30 = vsub.f32 %v90_v24, %v7706_v25  ;;  %v7260_v31 = vpack.c.bf16 %v7680_v10, %v7677_v8  ;;  %v168_v32 = vsel %vm76_vm0, %v138_v12, 0.0  ;;  %v205_v33 = vsel %vm76_vm0, %v190_v13, 0.0 }
  0x19   :  { %7241 = vmatprep.subr.bf16.mxu0 %v7549_v2  ;;  %v272_v34 = vadd.f32 1.0, %v103_v50  ;;  %v7266_v35 = vpack.c.bf16 %v7684_v14, %v7682_v11  ;;  %v7272_v36 = vpack.c.bf16 %v7688_v17, %v7686_v16  ;;  %v220_v37 = vsel %vm76_vm0, %v191_v18, 0.0  ;;  %v7749_v50 = vld [vmem:[%s8441_s1 + $0x48] sm:$0xff]  ;;  %v111_v11 = vld [vmem:[%s8441_s1 + $0x60] sm:$0xff] }
  0x1a   :  { %v273_v38 = vadd.f32 1.0, %v104_v54  ;;  %v154_v41 = vadd.f32 %v153_v29, %v152_v0  ;;  %v139_v42 = vmul.f32 %v121_v26, %v121_v26  ;;  %v192_v43 = vand.u32 2147483647, %v121_v26  ;;  %v112_v14 = vld [vmem:[%s8441_s1 + $0x68] sm:$0xff] }
  0x1b   :  { %6712 = vmatmul.mubr.msk.f32.vlgmr.msra.gmra.mrb[8].mxu0 %vm76_vm0, %v7619_v15  ;;  %v123_v44 = vsub.f32 %v7728_v39, %v7733_v40  ;;  %v169_v45 = vadd.f32 %v168_v32, %v167_v21  ;;  %v206_v46 = vadd.f32 %v205_v33, %v204_v22  ;;  %v242_v47 = vadd.f32 1.0, %v89_v19  ;;  %v7806_v21 = vld [vmem:[%s8440_s0 + $0x58] sm:$0xff] }
  0x1c   :  { %7243 = vmatpush3.bf16.msra.mxu0 %v7242_v1  ;;  %6725 = vmatprep.mubr.msk.f32.mxu0 %vm7551_vm1, %v7550_v5  ;;  %v140_v48 = vmul.f32 %v122_v30, %v122_v30  ;;  %v221_v51 = vadd.f32 %v220_v37, %v219_v23  ;;  %v7752_v52 = vmul.f32 0.5, %v272_v34  ;;  %v193_v53 = vand.u32 2147483647, %v122_v30  ;;  %v7811_v22 = vld [vmem:[%s8441_s1 + $0x58] sm:$0xff] }
  0x1d   :  { %7247 = vmatprep.subr.bf16.mxu0 %v7549_v2  ;;  %v124_v54 = vsub.f32 %v7744_v49, %v7749_v50  ;;  %v7756_v55 = vmul.f32 0.5, %v273_v38  ;;  %v7760_v56 = vmul.f32 %v7686_v16, %v7686_v16  ;;  %v7764_v57 = vmul.f32 %v7688_v17, %v7688_v17 }
  0x1e   :  { %v243_v58 = vadd.f32 1.0, %v90_v24  ;;  %v155_v59 = vsel %vm76_vm0, %v139_v42, 0.0  ;;  %v207_v60 = vsel %vm76_vm0, %v192_v43, 0.0  ;;  %v141_v61 = vmul.f32 %v123_v44, %v123_v44 }
  0x1f   :  { %6726 = vmatmul.mubr.msk.f32.vlgmr.msra.gmra.mrb[10].mxu0 %vm76_vm0, %v7619_v15  ;;  %v194_v62 = vand.u32 2147483647, %v123_v44  ;;  %v7774_v63 = vmul.f32 %v7752_v52, %v7752_v52  ;;  %v7778_v0 = vmul.f32 %v7752_v52, %v7686_v16  ;;  %v7780_v1 = vmul.f32 0.5, %v242_v47  ;;  %v95_v44 = vld [vmem:[%s8440_s0 + $0x60] sm:$0xff] }
  0x20   :  { %7249 = vmatpush3.bf16.msra.mxu0 %v7248_v27  ;;  %6739 = vmatprep.mubr.msk.f32.mxu0 %vm7551_vm1, %v7550_v5  ;;  %v170_v3 = vsel %vm76_vm0, %v140_v48, 0.0  ;;  %v222_v7 = vsel %vm76_vm0, %v193_v53, 0.0  ;;  %v142_v8 = vmul.f32 %v124_v54, %v124_v54  ;;  %v195_v9 = vand.u32 2147483647, %v124_v54 }
  0x21   :  { %7253 = vmatprep.subr.bf16.mxu0 %v7549_v2  ;;  %v125_v10 = vsub.f32 %v7786_v4, %v7791_v6  ;;  %v7799_v12 = vmul.f32 %v7756_v55, %v7756_v55  ;;  %v7801_v13 = vmul.f32 0.5, %v243_v58  ;;  %v156_v18 = vadd.f32 %v155_v59, %v154_v41 }
  0x22   :  { %v208_v19 = vadd.f32 %v207_v60, %v206_v46  ;;  %v157_v23 = vsel %vm76_vm0, %v141_v61, 0.0  ;;  %v209_v24 = vsel %vm76_vm0, %v194_v62, 0.0  ;;  %v126_v26 = vsub.f32 %v7806_v21, %v7811_v22 }
  0x23   :  { %6740 = vmatmul.mubr.msk.f32.vlgmr.msra.gmra.mrb[12].mxu0 %vm76_vm0, %v7619_v15  ;;  %v143_v27 = vmul.f32 %v125_v10, %v125_v10  ;;  %v171_v29 = vadd.f32 %v170_v3, %v169_v45  ;;  %v223_v30 = vadd.f32 %v222_v7, %v221_v51  ;;  %v196_v32 = vand.u32 2147483647, %v125_v10  ;;  %v96_v45 = vld [vmem:[%s8440_s0 + $0x68] sm:$0xff] }
  0x24   :  { %7255 = vmatpush3.bf16.msra.mxu0 %v7254_v28  ;;  %6753 = vmatprep.mubr.msk.f32.mxu0 %vm7551_vm1, %v7550_v5  ;;  %v7823_v28 = vmul.f32 %v7756_v55, %v7688_v17  ;;  %v172_v33 = vsel %vm76_vm0, %v142_v8, 0.0  ;;  %v224_v34 = vsel %vm76_vm0, %v195_v9, 0.0  ;;  %v144_v37 = vmul.f32 %v126_v26, %v126_v26 }
  0x25   :  { %7259 = vmatprep.subr.bf16.mxu0 %v7549_v2  ;;  %v197_v38 = vand.u32 2147483647, %v126_v26  ;;  %v7284_v41 = vpack.c.bf16 %v7764_v57, %v7760_v56  ;;  %v158_v42 = vadd.f32 %v157_v23, %v156_v18  ;;  %v210_v43 = vadd.f32 %v209_v24, %v208_v19 }
  0x26   :  { %v7290_v46 = vpack.c.bf16 %v7799_v12, %v7774_v63  ;;  %v7302_v47 = vpack.c.bf16 %v7801_v13, %v7780_v1  ;;  %v159_v48 = vsel %vm76_vm0, %v143_v27, 0.0  ;;  %v211_v51 = vsel %vm76_vm0, %v196_v32, 0.0  ;;  %v349_v12 = vld [vmem:[%s8443_s3] sm:$0xff] }
  0x27   :  { %6754 = vmatmul.mubr.msk.f32.vlgmr.msra.gmra.mrb[14].mxu0 %vm76_vm0, %v7619_v15  ;;  %v173_v53 = vadd.f32 %v172_v33, %v171_v29  ;;  %v225_v54 = vadd.f32 %v224_v34, %v223_v30  ;;  %v226_v58 = vsel %vm76_vm0, %v197_v38, 0.0  ;;  %v248_v59 = vadd.f32 1.0, %v95_v44 }
  0x28   :  { %7261 = vmatpush3.bf16.msra.mxu0 %v7260_v31  ;;  %6767 = vmatprep.mubr.msk.f32.mxu0 %vm7551_vm1, %v7550_v5  ;;  %v7278_v31 = vpack.c.bf16 %v7756_v55, %v7752_v52  ;;  %v7296_v52 = vpack.c.bf16 %v7823_v28, %v7778_v0  ;;  %v174_v55 = vsel %vm76_vm0, %v144_v37, 0.0  ;;  %v249_v60 = vadd.f32 1.0, %v96_v45  ;;  %v97_v37 = vld [vmem:[%s8440_s0 + $0x70] sm:$0xff] }
  0x29   :  { %7265 = vmatprep.subr.bf16.mxu0 %v7549_v2  ;;  %v7866_v61 = vadd.f32 1.0, %v7706_v25  ;;  %v160_v62 = vadd.f32 %v159_v48, %v158_v42  ;;  %v212_v3 = vadd.f32 %v211_v51, %v210_v43  ;;  %v7870_v7 = vmul.f32 0.5, %v248_v59  ;;  %v113_v48 = vld [vmem:[%s8441_s1 + $0x70] sm:$0xff] }
  0x2a   :  { %v7872_v8 = vmul.f32 0.5, %v249_v60  ;;  %v127_v9 = vsub.f32 %v95_v44, %v111_v11  ;;  %v128_v10 = vsub.f32 %v96_v45, %v112_v14  ;;  %v227_v25 = vadd.f32 %v226_v58, %v225_v54  ;;  %v98_v45 = vld [vmem:[%s8440_s0 + $0x78] sm:$0xff] }
  0x2b   :  { %6768 = vmatmul.mubr.msk.f32.vlgmr.msra.gmra.mrb[16].mxu0 %vm76_vm0, %v7619_v15  ;;  %v280_v18 = vadd.f32 1.0, %v111_v11  ;;  %v281_v19 = vadd.f32 1.0, %v112_v14  ;;  %v7888_v17 = vmul.f32 %v7870_v7, %v7870_v7  ;;  %v250_v11 = vadd.f32 1.0, %v97_v37 }
  0x2c   :  { %7267 = vmatpush3.bf16.msra.mxu0 %v7266_v35  ;;  %6781 = vmatprep.mubr.msk.f32.mxu0 %vm7551_vm1, %v7550_v5  ;;  %v7863_v35 = vadd.f32 1.0, %v7696_v20  ;;  %v175_v20 = vadd.f32 %v174_v55, %v173_v53  ;;  %v7392_v23 = vpack.c.bf16 %v7872_v8, %v7870_v7  ;;  %v145_v24 = vmul.f32 %v127_v9, %v127_v9  ;;  %v114_v55 = vld [vmem:[%s8441_s1 + $0x78] sm:$0xff] }
  0x2d   :  { %7271 = vmatprep.subr.bf16.mxu0 %v7549_v2  ;;  %v146_v26 = vmul.f32 %v128_v10, %v128_v10  ;;  %v198_v27 = vand.u32 2147483647, %v127_v9  ;;  %v199_v29 = vand.u32 2147483647, %v128_v10  ;;  %v7882_v30 = vmul.f32 0.5, %v280_v18 }
  0x2e   :  { %v7884_v16 = vmul.f32 0.5, %v281_v19  ;;  %v7897_v34 = vmul.f32 %v7872_v8, %v7872_v8  ;;  %v251_v14 = vadd.f32 1.0, %v98_v45  ;;  %v282_v9 = vadd.f32 1.0, %v113_v48 }
  0x2f   :  { %6782 = vmatmul.mubr.msk.f32.vlgmr.msra.gmra.mrb[18].mxu0 %vm76_vm0, %v7619_v15  ;;  %v176_v32 = vsel %vm76_vm0, %v146_v26, 0.0  ;;  %v213_v33 = vsel %vm76_vm0, %v198_v27, 0.0  ;;  %v228_v44 = vsel %vm76_vm0, %v199_v29, 0.0  ;;  %v7918_v54 = vmul.f32 %v7882_v30, %v7882_v30 }
  0x30   :  { %7273 = vmatpush3.bf16.msra.mxu0 %v7272_v36  ;;  %6795 = vmatprep.mubr.msk.f32.mxu0 %vm7551_vm1, %v7550_v5  ;;  %v161_v36 = vsel %vm76_vm0, %v145_v24, 0.0  ;;  %v177_v42 = vadd.f32 %v176_v32, %v175_v20  ;;  %v214_v43 = vadd.f32 %v213_v33, %v212_v3  ;;  %v229_v51 = vadd.f32 %v228_v44, %v227_v25  ;;  %v131_v32 = vld [vmem:[#allocation2] sm:$0xff]  ;;  %v132_v33 = vld [vmem:[#allocation2 + $0x8] sm:$0xff] }
  0x31   :  { %7277 = vmatprep.subr.bf16.mxu0 %v7549_v2  ;;  %v162_v38 = vadd.f32 %v161_v36, %v160_v62  ;;  %v7404_v53 = vpack.c.bf16 %v7897_v34, %v7888_v17  ;;  %v7925_v58 = vmul.f32 %v7884_v16, %v7884_v16  ;;  %v7929_v59 = vmul.f32 %v7882_v30, %v7870_v7 }
  0x32   :  { %v7933_v60 = vmul.f32 %v7884_v16, %v7872_v8  ;;  %v129_v62 = vsub.f32 %v97_v37, %v113_v48  ;;  %v130_v3 = vsub.f32 %v98_v45, %v114_v55  ;;  %v7946_v25 = vmul.f32 0.5, %v250_v11  ;;  %v184_v45 = vld [vmem:[#allocation3] sm:$0xff] }
  0x33   :  { %6796 = vmatmul.mubr.msk.f32.vlgmr.msra.gmra.mrb[20].mxu0 %vm76_vm0, %v7619_v15  ;;  %v7410_v10 = vpack.c.bf16 %v7925_v58, %v7918_v54  ;;  %v283_v18 = vadd.f32 1.0, %v114_v55  ;;  %v7949_v19 = vmul.f32 0.5, %v251_v14  ;;  %v185_v14 = vld [vmem:[#allocation3 + $0x8] sm:$0xff]  ;;  %vm81_vm2 = vcmask 46080  }
  0x34   :  { %7279 = vmatpush3.bf16.msra.mxu0 %v7278_v31  ;;  %6809 = vmatprep.mubr.msk.f32.mxu0 %vm7551_vm1, %v7550_v5  ;;  %v7398_v31 = vpack.c.bf16 %v7884_v16, %v7882_v30  ;;  %v7416_v20 = vpack.c.bf16 %v7933_v60, %v7929_v59  ;;  %v147_v24 = vmul.f32 %v129_v62, %v129_v62  ;;  %v200_v56 = vand.u32 2147483647, %v129_v62 }
  0x35   :  { %7283 = vmatprep.subr.bf16.mxu0 %v7549_v2  ;;  %v148_v26 = vmul.f32 %v130_v3, %v130_v3  ;;  %v201_v57 = vand.u32 2147483647, %v130_v3  ;;  %v7953_v27 = vmul.f32 0.5, %v283_v18  ;;  %v7957_v29 = vmul.f32 %v7946_v25, %v7946_v25  ;;  %82 = vst.msk [vmem:[#allocation4] sm:$0x3f] %vm81_vm2, %v7550_v5 }
  0x36   :  { %v7422_v36 = vpack.c.bf16 %v7949_v19, %v7946_v25  ;;  %v163_v37 = vsel %vm76_vm0, %v147_v24, 0.0  ;;  %v215_v48 = vsel %vm76_vm0, %v200_v56, 0.0  ;;  %v7977_v24 = vmul.f32 %v7949_v19, %v7949_v19 }
  0x37   :  { %6810 = vmatmul.mubr.msk.f32.vlgmr.msra.gmra.mrb[22].mxu0 %vm76_vm0, %v7619_v15  ;;  %v178_v44 = vsel %vm76_vm0, %v148_v26, 0.0  ;;  %v164_v55 = vadd.f32 %v163_v37, %v162_v38  ;;  %v216_v62 = vadd.f32 %v215_v48, %v214_v43  ;;  %v230_v3 = vsel %vm76_vm0, %v201_v57, 0.0 }
  0x38   :  { %7285 = vmatpush3.bf16.msra.mxu0 %v7284_v41  ;;  %6823 = vmatprep.mubr.msk.f32.mxu0 %vm7551_vm1, %v7550_v5  ;;  %v7951_v41 = vmul.f32 0.5, %v282_v9  ;;  %v179_v11 = vadd.f32 %v178_v44, %v177_v42  ;;  %v231_v9 = vadd.f32 %v230_v3, %v229_v51  ;;  %v7991_v51 = vmul.f32 %v7953_v27, %v7953_v27 }
  0x39   :  { %7289 = vmatprep.subr.bf16.mxu0 %v7549_v2  ;;  %v180_v38 = vadd.f32 %v164_v55, %v131_v32  ;;  %v232_v43 = vadd.f32 %v216_v62, %v184_v45  ;;  %v7434_v56 = vpack.c.bf16 %v7977_v24, %v7957_v29  ;;  %v8003_v32 = vmul.f32 %v7953_v27, %v7949_v19 }
  0x3a   :  { %v7428_v18 = vpack.c.bf16 %v7953_v27, %v7951_v41  ;;  %v7981_v63 = vmul.f32 %v7951_v41, %v7951_v41  ;;  %v181_v42 = vadd.f32 %v179_v11, %v132_v33  ;;  %v233_v26 = vadd.f32 %v231_v9, %v185_v14 }
  0x3b   :  { %6824 = vmatmul.mubr.msk.f32.vlgmr.msra.gmra.mrb[24].mxu0 %vm76_vm0, %v7619_v15  ;;  %v7999_v57 = vmul.f32 %v7951_v41, %v7946_v25  ;;  %v290_v33 = vmul.f32 0.5, %v7863_v35  ;;  %v291_v37 = vmul.f32 0.5, %v7866_v61  ;;  %182 = vst.msk [vmem:[#allocation2] sm:$0xff] %vm76_vm0, %v180_v38  ;;  %234 = vst.msk [vmem:[#allocation3] sm:$0xff] %vm76_vm0, %v232_v43  ;;  %v307_v35 = vmul.f32 %v7801_v13, %v7801_v13 }
  0x3c   :  { %7291 = vmatpush3.bf16.msra.mxu0 %v7290_v46  ;;  %6837 = vmatprep.mubr.msk.f32.mxu0 %vm7551_vm1, %v7550_v5  ;;  %v350_v46 = vld [vmem:[%s8443_s3 + $0x8] sm:$0xff]  ;;  %183 = vst.msk [vmem:[#allocation2 + $0x8] sm:$0xff] %vm76_vm0, %v181_v42  ;;  %v7440_v44 = vpack.c.bf16 %v7991_v51, %v7981_v63  ;;  %235 = vst.msk [vmem:[#allocation3 + $0x8] sm:$0xff] %vm76_vm0, %v233_v26  ;;  %v244_v55 = vadd.f32 1.0, %v7728_v39  ;;  %v245_v3 = vadd.f32 1.0, %v7744_v49  ;;  %v276_v9 = vadd.f32 1.0, %v7733_v40 }
  0x3d   :  { %7295 = vmatprep.subr.bf16.mxu0 %v7549_v2  ;;  %v8017_v45 = vpack.c.bf16 %v350_v46, %v349_v12  ;;  %v7446_v0 = vpack.c.bf16 %v8003_v32, %v7999_v57  ;;  %v7308_v28 = vpack.c.bf16 %v291_v37, %v290_v33  ;;  %v322_v61 = vmul.f32 %v290_v33, %v290_v33 }
  0x3e   :  { %v323_v48 = vmul.f32 %v291_v37, %v291_v37  ;;  %v338_v14 = vmul.f32 %v290_v33, %v7780_v1  ;;  %v339_v62 = vmul.f32 %v291_v37, %v7801_v13  ;;  %v260_v12 = vmul.f32 0.5, %v244_v55 }
  0x3f   :  { %6838 = vmatmul.mubr.msk.f32.vlgmr.msra.gmra.mrb[26].mxu0 %vm76_vm0, %v7619_v15  ;;  %7216 = vmatpush3.bf16.msra.mxu1 %v8017_v45  ;;  %v261_v46 = vmul.f32 0.5, %v245_v3  ;;  %v292_v40 = vmul.f32 0.5, %v276_v9  ;;  %v246_v37 = vadd.f32 1.0, %v7786_v4  ;;  %v278_v55 = vadd.f32 1.0, %v7791_v6 }
  0x40   :  { %7297 = vmatpush3.bf16.msra.mxu0 %v7296_v52  ;;  %6851 = vmatprep.mubr.msk.f32.mxu0 %vm7551_vm1, %v7550_v5  ;;  %v306_v52 = vmul.f32 %v7780_v1, %v7780_v1  ;;  %v7320_v11 = vpack.c.bf16 %v323_v48, %v322_v61  ;;  %v7326_v39 = vpack.c.bf16 %v339_v62, %v338_v14  ;;  %v277_v1 = vadd.f32 1.0, %v7749_v50 }
  0x41   :  { %7301 = vmatprep.subr.bf16.mxu0 %v7549_v2  ;;  %7220 = vmatprep.subr.bf16.mxu1 %v7549_v2  ;;  %v7332_v49 = vpack.c.bf16 %v261_v46, %v260_v12  ;;  %v308_v38 = vmul.f32 %v260_v12, %v260_v12  ;;  %v309_v42 = vmul.f32 %v261_v46, %v261_v46  ;;  %v262_v61 = vmul.f32 0.5, %v246_v37 }
  0x42   :  { %v293_v13 = vmul.f32 0.5, %v277_v1  ;;  %v324_v26 = vmul.f32 %v292_v40, %v292_v40  ;;  %v294_v14 = vmul.f32 0.5, %v278_v55  ;;  %vm6247_vm3 = vcmask 0  }
  0x43   :  { %6852 = vmatmul.mubr.msk.f32.vlgmr.msra.gmra.mrb[28].mxu0 %vm76_vm0, %v7619_v15  ;;  %v7344_v43 = vpack.c.bf16 %v309_v42, %v308_v38 }
  0x44   :  { %7303 = vmatpush3.bf16.msra.mxu0 %v7302_v47  ;;  %6865 = vmatprep.mubr.msk.f32.mxu0 %vm7551_vm1, %v7550_v5  ;;  %v7314_v47 = vpack.c.bf16 %v307_v35, %v306_v52  ;;  %v7338_v50 = vpack.c.bf16 %v293_v13, %v292_v40  ;;  %v325_v33 = vmul.f32 %v293_v13, %v293_v13 }
  0x45   :  { %7307 = vmatprep.subr.bf16.mxu0 %v7549_v2  ;;  %v340_v52 = vmul.f32 %v292_v40, %v260_v12  ;;  %v341_v35 = vmul.f32 %v293_v13, %v261_v46  ;;  %v342_v1 = vmul.f32 %v294_v14, %v262_v61 }
  0x47   :  { %6866 = vmatmul.mubr.msk.f32.vlgmr.msra.gmra.mrb[30].mxu0 %vm76_vm0, %v7619_v15  ;;  %v7356_v4 = vpack.c.bf16 %v341_v35, %v340_v52 }
  0x48   :  { %7309 = vmatpush3.bf16.msra.mxu0 %v7308_v28  ;;  %6879 = vmatprep.mubr.msk.f32.mxu0 %vm7551_vm1, %v7550_v5  ;;  %v7350_v28 = vpack.c.bf16 %v325_v33, %v324_v26 }
  0x49   :  { %7313 = vmatprep.subr.bf16.mxu0 %v7549_v2 }
  0x4b   :  { %6880 = vmatmul.mubr.msk.f32.vlgmr.msra.gmra.mrb[32].mxu0 %vm76_vm0, %v7619_v15 }
  0x4c   :  { %7315 = vmatpush3.bf16.msra.mxu0 %v7314_v47  ;;  %6893 = vmatprep.mubr.msk.f32.mxu0 %vm7551_vm1, %v7550_v5  ;;  %v247_v47 = vadd.f32 1.0, %v7806_v21 }
  0x4d   :  { %7319 = vmatprep.subr.bf16.mxu0 %v7549_v2 }
  0x4e   :  { %v263_v48 = vmul.f32 0.5, %v247_v47 }
  0x4f   :  { %6894 = vmatmul.mubr.msk.f32.vlgmr.msra.gmra.mrb[34].mxu0 %vm76_vm0, %v7619_v15 }
  0x50   :  { %7321 = vmatpush3.bf16.msra.mxu0 %v7320_v11  ;;  %6907 = vmatprep.mubr.msk.f32.mxu0 %vm7551_vm1, %v7550_v5  ;;  %v279_v11 = vadd.f32 1.0, %v7811_v22  ;;  %v7362_v21 = vpack.c.bf16 %v263_v48, %v262_v61  ;;  %v310_v22 = vmul.f32 %v262_v61, %v262_v61  ;;  %v311_v3 = vmul.f32 %v263_v48, %v263_v48 }
  0x51   :  { %7325 = vmatprep.subr.bf16.mxu0 %v7549_v2 }
  0x52   :  { %v295_v62 = vmul.f32 0.5, %v279_v11  ;;  %v7374_v9 = vpack.c.bf16 %v311_v3, %v310_v22 }
  0x53   :  { %6908 = vmatmul.mubr.msk.f32.vlgmr.msra.gmra.mrb[36].mxu0 %vm76_vm0, %v7619_v15 }
  0x54   :  { %7327 = vmatpush3.bf16.msra.mxu0 %v7326_v39  ;;  %6921 = vmatprep.mubr.msk.f32.mxu0 %vm7551_vm1, %v7550_v5  ;;  %v7368_v6 = vpack.c.bf16 %v295_v62, %v294_v14  ;;  %v326_v39 = vmul.f32 %v294_v14, %v294_v14  ;;  %v327_v12 = vmul.f32 %v295_v62, %v295_v62 }
  0x55   :  { %7331 = vmatprep.subr.bf16.mxu0 %v7549_v2 }
  0x56   :  { %v7380_v46 = vpack.c.bf16 %v327_v12, %v326_v39 }
  0x57   :  { %6922 = vmatmul.mubr.msk.f32.vlgmr.msra.gmra.mrb[38].mxu0 %vm76_vm0, %v7619_v15 }
  0x58   :  { %7333 = vmatpush3.bf16.msra.mxu0 %v7332_v49  ;;  %6935 = vmatprep.mubr.msk.f32.mxu0 %vm7551_vm1, %v7550_v5  ;;  %v343_v49 = vmul.f32 %v295_v62, %v263_v48 }
  0x59   :  { %7337 = vmatprep.subr.bf16.mxu0 %v7549_v2 }
  0x5a   :  { %v7386_v40 = vpack.c.bf16 %v343_v49, %v342_v1 }
  0x5b   :  { %6936 = vmatmul.mubr.msk.f32.vlgmr.msra.gmra.mrb[40].mxu0 %vm76_vm0, %v7619_v15 }
  0x5c   :  { %7339 = vmatpush3.bf16.msra.mxu0 %v7338_v50  ;;  %6949 = vmatprep.mubr.msk.f32.mxu0 %vm7551_vm1, %v7550_v5 }
  0x5d   :  { %7343 = vmatprep.subr.bf16.mxu0 %v7549_v2 }
  0x5f   :  { %6950 = vmatmul.mubr.msk.f32.vlgmr.msra.gmra.mrb[42].mxu0 %vm76_vm0, %v7619_v15 }
  0x60   :  { %7345 = vmatpush3.bf16.msra.mxu0 %v7344_v43  ;;  %6963 = vmatprep.mubr.msk.f32.mxu0 %vm7551_vm1, %v7550_v5 }
  0x61   :  { %7349 = vmatprep.subr.bf16.mxu0 %v7549_v2 }
  0x63   :  { %6964 = vmatmul.mubr.msk.f32.vlgmr.msra.gmra.mrb[44].mxu0 %vm76_vm0, %v7619_v15 }
  0x64   :  { %7351 = vmatpush3.bf16.msra.mxu0 %v7350_v28  ;;  %6977 = vmatprep.mubr.msk.f32.mxu0 %vm7551_vm1, %v7550_v5 }
  0x65   :  { %7355 = vmatprep.subr.bf16.mxu0 %v7549_v2 }
  0x67   :  { %6978 = vmatmul.mubr.msk.f32.vlgmr.msra.gmra.mrb[46].mxu0 %vm76_vm0, %v7619_v15 }
  0x68   :  { %7357 = vmatpush3.bf16.msra.mxu0 %v7356_v4  ;;  %6991 = vmatprep.mubr.msk.f32.mxu0 %vm7551_vm1, %v7550_v5 }
  0x69   :  { %7361 = vmatprep.subr.bf16.mxu0 %v7549_v2 }
  0x6b   :  { %6992 = vmatmul.mubr.msk.f32.vlgmr.msra.gmra.mrb[48].mxu0 %vm76_vm0, %v7619_v15 }
  0x6c   :  { %7363 = vmatpush3.bf16.msra.mxu0 %v7362_v21  ;;  %7005 = vmatprep.mubr.msk.f32.mxu0 %vm7551_vm1, %v7550_v5 }
  0x6d   :  { %7367 = vmatprep.subr.bf16.mxu0 %v7549_v2 }
  0x6f   :  { %7006 = vmatmul.mubr.msk.f32.vlgmr.msra.gmra.mrb[50].mxu0 %vm76_vm0, %v7619_v15 }
  0x70   :  { %7369 = vmatpush3.bf16.msra.mxu0 %v7368_v6  ;;  %7019 = vmatprep.mubr.msk.f32.mxu0 %vm7551_vm1, %v7550_v5 }
  0x71   :  { %7373 = vmatprep.subr.bf16.mxu0 %v7549_v2 }
  0x73   :  { %7020 = vmatmul.mubr.msk.f32.vlgmr.msra.gmra.mrb[52].mxu0 %vm76_vm0, %v7619_v15 }
  0x74   :  { %7375 = vmatpush3.bf16.msra.mxu0 %v7374_v9  ;;  %7033 = vmatprep.mubr.msk.f32.mxu0 %vm7551_vm1, %v7550_v5 }
  0x75   :  { %7379 = vmatprep.subr.bf16.mxu0 %v7549_v2 }
  0x77   :  { %7034 = vmatmul.mubr.msk.f32.vlgmr.msra.gmra.mrb[54].mxu0 %vm76_vm0, %v7619_v15 }
  0x78   :  { %7381 = vmatpush3.bf16.msra.mxu0 %v7380_v46  ;;  %7047 = vmatprep.mubr.msk.f32.mxu0 %vm7551_vm1, %v7550_v5 }
  0x79   :  { %7385 = vmatprep.subr.bf16.mxu0 %v7549_v2 }
  0x7b   :  { %7048 = vmatmul.mubr.msk.f32.vlgmr.msra.gmra.mrb[56].mxu0 %vm76_vm0, %v7619_v15 }
  0x7c   :  { %7387 = vmatpush3.bf16.msra.mxu0 %v7386_v40  ;;  %7061 = vmatprep.mubr.msk.f32.mxu0 %vm7551_vm1, %v7550_v5 }
  0x7d   :  { %7391 = vmatprep.subr.bf16.mxu0 %v7549_v2 }
  0x7f   :  { %7062 = vmatmul.mubr.msk.f32.vlgmr.msra.gmra.mrb[58].mxu0 %vm76_vm0, %v7619_v15 }
  0x80   :  { %7393 = vmatpush3.bf16.msra.mxu0 %v7392_v23  ;;  %7075 = vmatprep.mubr.msk.f32.mxu0 %vm7551_vm1, %v7550_v5 }
  0x81   :  { %7397 = vmatprep.subr.bf16.mxu0 %v7549_v2 }
  0x83   :  { %7076 = vmatmul.mubr.msk.f32.vlgmr.msra.gmra.mrb[60].mxu0 %vm76_vm0, %v7619_v15 }
  0x84   :  { %7399 = vmatpush3.bf16.msra.mxu0 %v7398_v31  ;;  %7089 = vmatprep.mubr.msk.f32.mxu0 %vm7551_vm1, %v7550_v5 }
  0x85   :  { %7403 = vmatprep.subr.bf16.mxu0 %v7549_v2 }
  0x87   :  { %7090 = vmatmul.mubr.msk.f32.vlgmr.msra.gmra.mrb[62].mxu0 %vm76_vm0, %v7619_v15 }
  0x88   :  { %7405 = vmatpush3.bf16.msra.mxu0 %v7404_v53  ;;  %7103 = vmatprep.mubr.msk.f32.mxu0 %vm7551_vm1, %v7550_v5 }
  0x89   :  { %7409 = vmatprep.subr.bf16.mxu0 %v7549_v2 }
  0x8b   :  { %7104 = vmatmul.mubr.msk.f32.vlgmr.msra.gmra.mrb[64].mxu0 %vm76_vm0, %v7619_v15 }
  0x8c   :  { %7411 = vmatpush3.bf16.msra.mxu0 %v7410_v10  ;;  %7117 = vmatprep.mubr.msk.f32.mxu0 %vm7551_vm1, %v7550_v5 }
  0x8d   :  { %7415 = vmatprep.subr.bf16.mxu0 %v7549_v2 }
  0x8f   :  { %7118 = vmatmul.mubr.msk.f32.vlgmr.msra.gmra.mrb[66].mxu0 %vm76_vm0, %v7619_v15 }
  0x90   :  { %7417 = vmatpush3.bf16.msra.mxu0 %v7416_v20  ;;  %7131 = vmatprep.mubr.msk.f32.mxu0 %vm7551_vm1, %v7550_v5 }
  0x91   :  { %7421 = vmatprep.subr.bf16.mxu0 %v7549_v2 }
  0x93   :  { %7132 = vmatmul.mubr.msk.f32.vlgmr.msra.gmra.mrb[68].mxu0 %vm76_vm0, %v7619_v15 }
  0x94   :  { %7423 = vmatpush3.bf16.msra.mxu0 %v7422_v36  ;;  %7145 = vmatprep.mubr.msk.f32.mxu0 %vm7551_vm1, %v7550_v5 }
  0x95   :  { %7427 = vmatprep.subr.bf16.mxu0 %v7549_v2 }
  0x97   :  { %7146 = vmatmul.mubr.msk.f32.vlgmr.msra.gmra.mrb[70].mxu0 %vm76_vm0, %v7619_v15 }
  0x98   :  { %7429 = vmatpush3.bf16.msra.mxu0 %v7428_v18  ;;  %7159 = vmatprep.mubr.msk.f32.mxu0 %vm7551_vm1, %v7550_v5 }
  0x99   :  { %7433 = vmatprep.subr.bf16.mxu0 %v7549_v2 }
  0x9b   :  { %7160 = vmatmul.mubr.msk.f32.vlgmr.msra.gmra.mrb[72].mxu0 %vm76_vm0, %v7619_v15 }
  0x9c   :  { %7435 = vmatpush3.bf16.msra.mxu0 %v7434_v56  ;;  %7173 = vmatprep.mubr.msk.f32.mxu0 %vm7551_vm1, %v7550_v5 }
  0x9d   :  { %7439 = vmatprep.subr.bf16.mxu0 %v7549_v2 }
  0x9f   :  { %7174 = vmatmul.mubr.msk.f32.vlgmr.msra.gmra.mrb[74].mxu0 %vm76_vm0, %v7619_v15 }
  0xa0   :  { %7441 = vmatpush3.bf16.msra.mxu0 %v7440_v44  ;;  %7187 = vmatprep.mubr.msk.f32.mxu0 %vm7551_vm1, %v7550_v5 }
  0xa1   :  { %7445 = vmatprep.subr.bf16.mxu0 %v7549_v2 }
  0xa3   :  { %7188 = vmatmul.mubr.msk.f32.vlgmr.msra.gmra.mrb[76].mxu0 %vm76_vm0, %v7619_v15 }
  0xa4   :  { %7447 = vmatpush3.bf16.msra.mxu0 %v7446_v0  ;;  %7201 = vmatprep.mubr.msk.f32.mxu0 %vm7551_vm1, %v7550_v5 }
  0xa7   :  { %7202 = vmatmul.mubr.msk.f32.vlgmr.msra.gmra.mrb[78].mxu0 %vm76_vm0, %v7619_v15 }
  0xde   :  { %v420_v7 = vpop.f32.mrb[0].mxu0 }
  0xdf   :  { %v6657_v8 = vpop.f32.mrb[1].mxu0  ;;  %6663 = vmatmul.mubr.msk.f32.vlgmr.msra.gmra.mrb[0].mxu1 %vm76_vm0, %v420_v7 }
  0xe0   :  { %7222 = vmatpush3.bf16.msra.mxu1 %v8017_v45  ;;  %6676 = vmatprep.mubr.msk.f32.mxu1 %vm7551_vm1, %v7550_v5 }
  0xe1   :  { %7226 = vmatprep.subr.bf16.mxu1 %v7549_v2 }
  0xe2   :  { %v563_v23 = vpop.f32.mrb[2].mxu0 }
  0xe3   :  { %v6671_v30 = vpop.f32.mrb[3].mxu0  ;;  %6677 = vmatmul.mubr.msk.f32.vlgmr.msra.gmra.mrb[2].mxu1 %vm76_vm0, %v563_v23 }
  0xe4   :  { %7228 = vmatpush3.bf16.msra.mxu1 %v8017_v45  ;;  %6690 = vmatprep.mubr.msk.f32.mxu1 %vm7551_vm1, %v7550_v5 }
  0xe5   :  { %7232 = vmatprep.subr.bf16.mxu1 %v7549_v2 }
  0xe6   :  { %v706_v15 = vpop.f32.mrb[4].mxu0 }
  0xe7   :  { %v6685_v16 = vpop.f32.mrb[5].mxu0  ;;  %6691 = vmatmul.mubr.msk.f32.vlgmr.msra.gmra.mrb[4].mxu1 %vm76_vm0, %v706_v15 }
  0xe8   :  { %7234 = vmatpush3.bf16.msra.mxu1 %v8017_v45  ;;  %6704 = vmatprep.mubr.msk.f32.mxu1 %vm7551_vm1, %v7550_v5 }
  0xe9   :  { %7238 = vmatprep.subr.bf16.mxu1 %v7549_v2 }
  0xea   :  { %v849_v17 = vpop.f32.mrb[6].mxu0 }
  0xeb   :  { %v6699_v34 = vpop.f32.mrb[7].mxu0  ;;  %6705 = vmatmul.mubr.msk.f32.vlgmr.msra.gmra.mrb[6].mxu1 %vm76_vm0, %v849_v17 }
  0xec   :  { %7240 = vmatpush3.bf16.msra.mxu1 %v8017_v45  ;;  %6718 = vmatprep.mubr.msk.f32.mxu1 %vm7551_vm1, %v7550_v5 }
  0xed   :  { %7244 = vmatprep.subr.bf16.mxu1 %v7549_v2 }
  0xee   :  { %v992_v31 = vpop.f32.mrb[8].mxu0 }
  0xef   :  { %v6713_v53 = vpop.f32.mrb[9].mxu0  ;;  %6719 = vmatmul.mubr.msk.f32.vlgmr.msra.gmra.mrb[8].mxu1 %vm76_vm0, %v992_v31 }
  0xf0   :  { %7246 = vmatpush3.bf16.msra.mxu1 %v8017_v45  ;;  %6732 = vmatprep.mubr.msk.f32.mxu1 %vm7551_vm1, %v7550_v5 }
  0xf1   :  { %7250 = vmatprep.subr.bf16.mxu1 %v7549_v2 }
  0xf2   :  { %v1153_v54 = vpop.f32.mrb[10].mxu0 }
  0xf3   :  { %v6727_v58 = vpop.f32.mrb[11].mxu0  ;;  %6733 = vmatmul.mubr.msk.f32.vlgmr.msra.gmra.mrb[10].mxu1 %vm76_vm0, %v1153_v54 }
  0xf4   :  { %7252 = vmatpush3.bf16.msra.mxu1 %v8017_v45  ;;  %6746 = vmatprep.mubr.msk.f32.mxu1 %vm7551_vm1, %v7550_v5 }
  0xf5   :  { %7256 = vmatprep.subr.bf16.mxu1 %v7549_v2 }
  0xf6   :  { %v1296_v59 = vpop.f32.mrb[12].mxu0 }
  0xf7   :  { %v6741_v60 = vpop.f32.mrb[13].mxu0  ;;  %6747 = vmatmul.mubr.msk.f32.vlgmr.msra.gmra.mrb[12].mxu1 %vm76_vm0, %v1296_v59 }
  0xf8   :  { %7258 = vmatpush3.bf16.msra.mxu1 %v8017_v45  ;;  %6760 = vmatprep.mubr.msk.f32.mxu1 %vm7551_vm1, %v7550_v5 }
  0xf9   :  { %7262 = vmatprep.subr.bf16.mxu1 %v7549_v2 }
  0xfa   :  { %v1439_v10 = vpop.f32.mrb[14].mxu0 }
  0xfb   :  { %v6755_v20 = vpop.f32.mrb[15].mxu0  ;;  %6761 = vmatmul.mubr.msk.f32.vlgmr.msra.gmra.mrb[14].mxu1 %vm76_vm0, %v1439_v10 }
  0xfc   :  { %7264 = vmatpush3.bf16.msra.mxu1 %v8017_v45  ;;  %6774 = vmatprep.mubr.msk.f32.mxu1 %vm7551_vm1, %v7550_v5 }
  0xfd   :  { %7268 = vmatprep.subr.bf16.mxu1 %v7549_v2 }
  0xfe   :  { %v1582_v25 = vpop.f32.mrb[16].mxu0 }
  0xff   :  { %v6769_v19 = vpop.f32.mrb[17].mxu0  ;;  %6775 = vmatmul.mubr.msk.f32.vlgmr.msra.gmra.mrb[16].mxu1 %vm76_vm0, %v1582_v25 }
 0x100   :  { %7270 = vmatpush3.bf16.msra.mxu1 %v8017_v45  ;;  %6788 = vmatprep.mubr.msk.f32.mxu1 %vm7551_vm1, %v7550_v5 }
 0x101   :  { %7274 = vmatprep.subr.bf16.mxu1 %v7549_v2 }
 0x102   :  { %v1725_v41 = vpop.f32.mrb[18].mxu0 }
 0x103   :  { %v6783_v27 = vpop.f32.mrb[19].mxu0  ;;  %6789 = vmatmul.mubr.msk.f32.vlgmr.msra.gmra.mrb[18].mxu1 %vm76_vm0, %v1725_v41 }
 0x104   :  { %7276 = vmatpush3.bf16.msra.mxu1 %v8017_v45  ;;  %6802 = vmatprep.mubr.msk.f32.mxu1 %vm7551_vm1, %v7550_v5 }
 0x105   :  { %7280 = vmatprep.subr.bf16.mxu1 %v7549_v2 }
 0x106   :  { %v1887_v29 = vpop.f32.mrb[20].mxu0 }
 0x107   :  { %v6797_v36 = vpop.f32.mrb[21].mxu0  ;;  %6803 = vmatmul.mubr.msk.f32.vlgmr.msra.gmra.mrb[20].mxu1 %vm76_vm0, %v1887_v29 }
 0x108   :  { %7282 = vmatpush3.bf16.msra.mxu1 %v8017_v45  ;;  %6816 = vmatprep.mubr.msk.f32.mxu1 %vm7551_vm1, %v7550_v5 }
 0x109   :  { %7286 = vmatprep.subr.bf16.mxu1 %v7549_v2 }
 0x10a   :  { %v2030_v18 = vpop.f32.mrb[22].mxu0 }
 0x10b   :  { %v6811_v24 = vpop.f32.mrb[23].mxu0  ;;  %6817 = vmatmul.mubr.msk.f32.vlgmr.msra.gmra.mrb[22].mxu1 %vm76_vm0, %v2030_v18 }
 0x10c   :  { %7288 = vmatpush3.bf16.msra.mxu1 %v8017_v45  ;;  %6830 = vmatprep.mubr.msk.f32.mxu1 %vm7551_vm1, %v7550_v5 }
 0x10d   :  { %7292 = vmatprep.subr.bf16.mxu1 %v7549_v2 }
 0x10e   :  { %v2173_v63 = vpop.f32.mrb[24].mxu0 }
 0x10f   :  { %v6825_v51 = vpop.f32.mrb[25].mxu0  ;;  %6831 = vmatmul.mubr.msk.f32.vlgmr.msra.gmra.mrb[24].mxu1 %vm76_vm0, %v2173_v63 }
 0x110   :  { %7294 = vmatpush3.bf16.msra.mxu1 %v8017_v45  ;;  %6844 = vmatprep.mubr.msk.f32.mxu1 %vm7551_vm1, %v7550_v5 }
 0x111   :  { %7298 = vmatprep.subr.bf16.mxu1 %v7549_v2 }
 0x112   :  { %v2316_v56 = vpop.f32.mrb[26].mxu0 }
 0x113   :  { %v6839_v57 = vpop.f32.mrb[27].mxu0  ;;  %6845 = vmatmul.mubr.msk.f32.vlgmr.msra.gmra.mrb[26].mxu1 %vm76_vm0, %v2316_v56 }
 0x114   :  { %7300 = vmatpush3.bf16.msra.mxu1 %v8017_v45  ;;  %6858 = vmatprep.mubr.msk.f32.mxu1 %vm7551_vm1, %v7550_v5 }
 0x115   :  { %7304 = vmatprep.subr.bf16.mxu1 %v7549_v2 }
 0x116   :  { %v2459_v32 = vpop.f32.mrb[28].mxu0 }
 0x117   :  { %v6853_v44 = vpop.f32.mrb[29].mxu0  ;;  %6859 = vmatmul.mubr.msk.f32.vlgmr.msra.gmra.mrb[28].mxu1 %vm76_vm0, %v2459_v32 }
 0x118   :  { %7306 = vmatpush3.bf16.msra.mxu1 %v8017_v45  ;;  %6872 = vmatprep.mubr.msk.f32.mxu1 %vm7551_vm1, %v7550_v5 }
 0x119   :  { %7310 = vmatprep.subr.bf16.mxu1 %v7549_v2 }
 0x11a   :  { %v2621_v0 = vpop.f32.mrb[30].mxu0 }
 0x11b   :  { %v6867_v13 = vpop.f32.mrb[31].mxu0  ;;  %6873 = vmatmul.mubr.msk.f32.vlgmr.msra.gmra.mrb[30].mxu1 %vm76_vm0, %v2621_v0 }
 0x11c   :  { %7312 = vmatpush3.bf16.msra.mxu1 %v8017_v45  ;;  %6886 = vmatprep.mubr.msk.f32.mxu1 %vm7551_vm1, %v7550_v5 }
 0x11d   :  { %7316 = vmatprep.subr.bf16.mxu1 %v7549_v2 }
 0x11e   :  { %v2764_v50 = vpop.f32.mrb[32].mxu0 }
 0x11f   :  { %v6881_v38 = vpop.f32.mrb[33].mxu0  ;;  %6887 = vmatmul.mubr.msk.f32.vlgmr.msra.gmra.mrb[32].mxu1 %vm76_vm0, %v2764_v50 }
 0x120   :  { %7318 = vmatpush3.bf16.msra.mxu1 %v8017_v45  ;;  %6900 = vmatprep.mubr.msk.f32.mxu1 %vm7551_vm1, %v7550_v5 }
 0x121   :  { %7322 = vmatprep.subr.bf16.mxu1 %v7549_v2 }
 0x122   :  { %v2907_v42 = vpop.f32.mrb[34].mxu0 }
 0x123   :  { %v6895_v43 = vpop.f32.mrb[35].mxu0  ;;  %6901 = vmatmul.mubr.msk.f32.vlgmr.msra.gmra.mrb[34].mxu1 %vm76_vm0, %v2907_v42 }
 0x124   :  { %7324 = vmatpush3.bf16.msra.mxu1 %v8017_v45  ;;  %6914 = vmatprep.mubr.msk.f32.mxu1 %vm7551_vm1, %v7550_v5 }
 0x125   :  { %7328 = vmatprep.subr.bf16.mxu1 %v7549_v2 }
 0x126   :  { %v3050_v26 = vpop.f32.mrb[36].mxu0 }
 0x127   :  { %v6909_v33 = vpop.f32.mrb[37].mxu0  ;;  %6915 = vmatmul.mubr.msk.f32.vlgmr.msra.gmra.mrb[36].mxu1 %vm76_vm0, %v3050_v26 }
 0x128   :  { %7330 = vmatpush3.bf16.msra.mxu1 %v8017_v45  ;;  %6928 = vmatprep.mubr.msk.f32.mxu1 %vm7551_vm1, %v7550_v5 }
 0x129   :  { %7334 = vmatprep.subr.bf16.mxu1 %v7549_v2 }
 0x12a   :  { %v3193_v37 = vpop.f32.mrb[38].mxu0 }
 0x12b   :  { %v6923_v28 = vpop.f32.mrb[39].mxu0  ;;  %6929 = vmatmul.mubr.msk.f32.vlgmr.msra.gmra.mrb[38].mxu1 %vm76_vm0, %v3193_v37 }
 0x12c   :  { %7336 = vmatpush3.bf16.msra.mxu1 %v8017_v45  ;;  %6942 = vmatprep.mubr.msk.f32.mxu1 %vm7551_vm1, %v7550_v5 }
 0x12d   :  { %7340 = vmatprep.subr.bf16.mxu1 %v7549_v2 }
 0x12e   :  { %v3355_v52 = vpop.f32.mrb[40].mxu0 }
 0x12f   :  { %v6937_v35 = vpop.f32.mrb[41].mxu0  ;;  %6943 = vmatmul.mubr.msk.f32.vlgmr.msra.gmra.mrb[40].mxu1 %vm76_vm0, %v3355_v52 }
 0x130   :  { %7342 = vmatpush3.bf16.msra.mxu1 %v8017_v45  ;;  %6956 = vmatprep.mubr.msk.f32.mxu1 %vm7551_vm1, %v7550_v5 }
 0x131   :  { %7346 = vmatprep.subr.bf16.mxu1 %v7549_v2 }
 0x132   :  { %v3498_v47 = vpop.f32.mrb[42].mxu0 }
 0x133   :  { %v6951_v61 = vpop.f32.mrb[43].mxu0  ;;  %6957 = vmatmul.mubr.msk.f32.vlgmr.msra.gmra.mrb[42].mxu1 %vm76_vm0, %v3498_v47 }
 0x134   :  { %7348 = vmatpush3.bf16.msra.mxu1 %v8017_v45  ;;  %6970 = vmatprep.mubr.msk.f32.mxu1 %vm7551_vm1, %v7550_v5 }
 0x135   :  { %7352 = vmatprep.subr.bf16.mxu1 %v7549_v2 }
 0x136   :  { %v3641_v4 = vpop.f32.mrb[44].mxu0 }
 0x137   :  { %v6965_v48 = vpop.f32.mrb[45].mxu0  ;;  %6971 = vmatmul.mubr.msk.f32.vlgmr.msra.gmra.mrb[44].mxu1 %vm76_vm0, %v3641_v4 }
 0x138   :  { %7354 = vmatpush3.bf16.msra.mxu1 %v8017_v45  ;;  %6984 = vmatprep.mubr.msk.f32.mxu1 %vm7551_vm1, %v7550_v5 }
 0x139   :  { %7358 = vmatprep.subr.bf16.mxu1 %v7549_v2 }
 0x13a   :  { %v3784_v55 = vpop.f32.mrb[46].mxu0 }
 0x13b   :  { %v6979_v11 = vpop.f32.mrb[47].mxu0  ;;  %6985 = vmatmul.mubr.msk.f32.vlgmr.msra.gmra.mrb[46].mxu1 %vm76_vm0, %v3784_v55 }
 0x13c   :  { %7360 = vmatpush3.bf16.msra.mxu1 %v8017_v45  ;;  %6998 = vmatprep.mubr.msk.f32.mxu1 %vm7551_vm1, %v7550_v5 }
 0x13d   :  { %7364 = vmatprep.subr.bf16.mxu1 %v7549_v2 }
 0x13e   :  { %v3927_v21 = vpop.f32.mrb[48].mxu0 }
 0x13f   :  { %v6993_v14 = vpop.f32.mrb[49].mxu0  ;;  %6999 = vmatmul.mubr.msk.f32.vlgmr.msra.gmra.mrb[48].mxu1 %vm76_vm0, %v3927_v21 }
 0x140   :  { %7366 = vmatpush3.bf16.msra.mxu1 %v8017_v45  ;;  %7012 = vmatprep.mubr.msk.f32.mxu1 %vm7551_vm1, %v7550_v5 }
 0x141   :  { %7370 = vmatprep.subr.bf16.mxu1 %v7549_v2 }
 0x142   :  { %v4089_v62 = vpop.f32.mrb[50].mxu0 }
 0x143   :  { %v7007_v6 = vpop.f32.mrb[51].mxu0  ;;  %7013 = vmatmul.mubr.msk.f32.vlgmr.msra.gmra.mrb[50].mxu1 %vm76_vm0, %v4089_v62 }
 0x144   :  { %7372 = vmatpush3.bf16.msra.mxu1 %v8017_v45  ;;  %7026 = vmatprep.mubr.msk.f32.mxu1 %vm7551_vm1, %v7550_v5 }
 0x145   :  { %7376 = vmatprep.subr.bf16.mxu1 %v7549_v2 }
 0x146   :  { %v4232_v22 = vpop.f32.mrb[52].mxu0 }
 0x147   :  { %v7021_v3 = vpop.f32.mrb[53].mxu0  ;;  %7027 = vmatmul.mubr.msk.f32.vlgmr.msra.gmra.mrb[52].mxu1 %vm76_vm0, %v4232_v22 }
 0x148   :  { %7378 = vmatpush3.bf16.msra.mxu1 %v8017_v45  ;;  %7040 = vmatprep.mubr.msk.f32.mxu1 %vm7551_vm1, %v7550_v5 }
 0x149   :  { %7382 = vmatprep.subr.bf16.mxu1 %v7549_v2 }
 0x14a   :  { %v4375_v9 = vpop.f32.mrb[54].mxu0 }
 0x14b   :  { %v7035_v39 = vpop.f32.mrb[55].mxu0  ;;  %7041 = vmatmul.mubr.msk.f32.vlgmr.msra.gmra.mrb[54].mxu1 %vm76_vm0, %v4375_v9 }
 0x14c   :  { %7384 = vmatpush3.bf16.msra.mxu1 %v8017_v45  ;;  %7054 = vmatprep.mubr.msk.f32.mxu1 %vm7551_vm1, %v7550_v5 }
 0x14d   :  { %7388 = vmatprep.subr.bf16.mxu1 %v7549_v2 }
 0x14e   :  { %v4518_v12 = vpop.f32.mrb[56].mxu0 }
 0x14f   :  { %v7049_v46 = vpop.f32.mrb[57].mxu0  ;;  %7055 = vmatmul.mubr.msk.f32.vlgmr.msra.gmra.mrb[56].mxu1 %vm76_vm0, %v4518_v12 }
 0x150   :  { %7390 = vmatpush3.bf16.msra.mxu1 %v8017_v45  ;;  %7068 = vmatprep.mubr.msk.f32.mxu1 %vm7551_vm1, %v7550_v5 }
 0x151   :  { %7394 = vmatprep.subr.bf16.mxu1 %v7549_v2 }
 0x152   :  { %v4661_v1 = vpop.f32.mrb[58].mxu0 }
 0x153   :  { %v7063_v49 = vpop.f32.mrb[59].mxu0  ;;  %7069 = vmatmul.mubr.msk.f32.vlgmr.msra.gmra.mrb[58].mxu1 %vm76_vm0, %v4661_v1 }
 0x154   :  { %7396 = vmatpush3.bf16.msra.mxu1 %v8017_v45  ;;  %7082 = vmatprep.mubr.msk.f32.mxu1 %vm7551_vm1, %v7550_v5 }
 0x155   :  { %7400 = vmatprep.subr.bf16.mxu1 %v7549_v2 }
 0x156   :  { %v4823_v40 = vpop.f32.mrb[60].mxu0 }
 0x157   :  { %v7077_v7 = vpop.f32.mrb[61].mxu0  ;;  %7083 = vmatmul.mubr.msk.f32.vlgmr.msra.gmra.mrb[60].mxu1 %vm76_vm0, %v4823_v40 }
 0x158   :  { %7402 = vmatpush3.bf16.msra.mxu1 %v8017_v45  ;;  %7096 = vmatprep.mubr.msk.f32.mxu1 %vm7551_vm1, %v7550_v5 }
 0x159   :  { %7406 = vmatprep.subr.bf16.mxu1 %v7549_v2 }
 0x15a   :  { %v4966_v8 = vpop.f32.mrb[62].mxu0 }
 0x15b   :  { %v7091_v23 = vpop.f32.mrb[63].mxu0  ;;  %7097 = vmatmul.mubr.msk.f32.vlgmr.msra.gmra.mrb[62].mxu1 %vm76_vm0, %v4966_v8 }
 0x15c   :  { %7408 = vmatpush3.bf16.msra.mxu1 %v8017_v45  ;;  %7110 = vmatprep.mubr.msk.f32.mxu1 %vm7551_vm1, %v7550_v5 }
 0x15d   :  { %7412 = vmatprep.subr.bf16.mxu1 %v7549_v2 }
 0x15e   :  { %v5109_v30 = vpop.f32.mrb[64].mxu0 }
 0x15f   :  { %v7105_v15 = vpop.f32.mrb[65].mxu0  ;;  %7111 = vmatmul.mubr.msk.f32.vlgmr.msra.gmra.mrb[64].mxu1 %vm76_vm0, %v5109_v30 }
 0x160   :  { %7414 = vmatpush3.bf16.msra.mxu1 %v8017_v45  ;;  %7124 = vmatprep.mubr.msk.f32.mxu1 %vm7551_vm1, %v7550_v5 }
 0x161   :  { %7418 = vmatprep.subr.bf16.mxu1 %v7549_v2 }
 0x162   :  { %v5252_v16 = vpop.f32.mrb[66].mxu0 }
 0x163   :  { %v7119_v17 = vpop.f32.mrb[67].mxu0  ;;  %7125 = vmatmul.mubr.msk.f32.vlgmr.msra.gmra.mrb[66].mxu1 %vm76_vm0, %v5252_v16 }
 0x164   :  { %7420 = vmatpush3.bf16.msra.mxu1 %v8017_v45  ;;  %7138 = vmatprep.mubr.msk.f32.mxu1 %vm7551_vm1, %v7550_v5 }
 0x165   :  { %7424 = vmatprep.subr.bf16.mxu1 %v7549_v2 }
 0x166   :  { %v5395_v34 = vpop.f32.mrb[68].mxu0 }
 0x167   :  { %v7133_v31 = vpop.f32.mrb[69].mxu0  ;;  %7139 = vmatmul.mubr.msk.f32.vlgmr.msra.gmra.mrb[68].mxu1 %vm76_vm0, %v5395_v34 }
 0x168   :  { %7426 = vmatpush3.bf16.msra.mxu1 %v8017_v45  ;;  %7152 = vmatprep.mubr.msk.f32.mxu1 %vm7551_vm1, %v7550_v5 }
 0x169   :  { %7430 = vmatprep.subr.bf16.mxu1 %v7549_v2 }
 0x16a   :  { %v5557_v53 = vpop.f32.mrb[70].mxu0 }
 0x16b   :  { %v7147_v54 = vpop.f32.mrb[71].mxu0  ;;  %7153 = vmatmul.mubr.msk.f32.vlgmr.msra.gmra.mrb[70].mxu1 %vm76_vm0, %v5557_v53 }
 0x16c   :  { %7432 = vmatpush3.bf16.msra.mxu1 %v8017_v45  ;;  %7166 = vmatprep.mubr.msk.f32.mxu1 %vm7551_vm1, %v7550_v5 }
 0x16d   :  { %7436 = vmatprep.subr.bf16.mxu1 %v7549_v2 }
 0x16e   :  { %v5700_v58 = vpop.f32.mrb[72].mxu0 }
 0x16f   :  { %v7161_v59 = vpop.f32.mrb[73].mxu0  ;;  %7167 = vmatmul.mubr.msk.f32.vlgmr.msra.gmra.mrb[72].mxu1 %vm76_vm0, %v5700_v58 }
 0x170   :  { %7438 = vmatpush3.bf16.msra.mxu1 %v8017_v45  ;;  %7180 = vmatprep.mubr.msk.f32.mxu1 %vm7551_vm1, %v7550_v5 }
 0x171   :  { %7442 = vmatprep.subr.bf16.mxu1 %v7549_v2 }
 0x172   :  { %v5843_v60 = vpop.f32.mrb[74].mxu0 }
 0x173   :  { %v7175_v10 = vpop.f32.mrb[75].mxu0  ;;  %7181 = vmatmul.mubr.msk.f32.vlgmr.msra.gmra.mrb[74].mxu1 %vm76_vm0, %v5843_v60 }
 0x174   :  { %7444 = vmatpush3.bf16.msra.mxu1 %v8017_v45  ;;  %7194 = vmatprep.mubr.msk.f32.mxu1 %vm7551_vm1, %v7550_v5  ;;  %v6232_v10 = vld [vmem:[#allocation2] sm:$0xff] }
 0x175   :  { %7448 = vmatprep.subr.bf16.mxu1 %v7549_v2 }
 0x176   :  { %v5986_v20 = vpop.f32.mrb[76].mxu0 }
 0x177   :  { %v7189_v25 = vpop.f32.mrb[77].mxu0  ;;  %7195 = vmatmul.mubr.msk.f32.vlgmr.msra.gmra.mrb[76].mxu1 %vm76_vm0, %v5986_v20  ;;  %v6233_v20 = vld [vmem:[#allocation2 + $0x8] sm:$0xff] }
 0x178   :  { %7450 = vmatpush3.bf16.msra.mxu1 %v8017_v45  ;;  %7208 = vmatprep.mubr.msk.f32.mxu1 %vm7551_vm1, %v7550_v5 }
 0x17a   :  { %v6129_v19 = vpop.f32.mrb[78].mxu0 }
 0x17b   :  { %7209 = vmatmul.mubr.msk.f32.vlgmr.msra.gmra.mrb[78].mxu1 %vm76_vm0, %v6129_v19  ;;  %v7203_v41 = vpop.f32.mrb[79].mxu0 }
 0x1b2   :  { %v493_v27 = vpop.f32.mrb[0].mxu1 }
 0x1b3   :  { %v6664_v29 = vpop.f32.mrb[1].mxu1  ;;  %v1069_v18 = vmul.f32 %v493_v27, %v493_v27 }
 0x1b4   :  { %v6235_v29 = vsel %vm76_vm0, %v6233_v20, 0.0 }
 0x1b6   :  { %v636_v36 = vpop.f32.mrb[2].mxu1 }
 0x1b7   :  { %v1070_v24 = vmul.f32 %v636_v36, %v636_v36  ;;  %v1071_v63 = vmul.f32 %v636_v36, %v493_v27  ;;  %v6678_v2 = vpop.f32.mrb[3].mxu1  ;;  %v6234_v27 = vsel %vm76_vm0, %v6232_v10, 0.0 }
 0x1b8   :  { %v6236_v36 = vadd.f32 %v6235_v29, %v6234_v27 }
 0x1b9   :  { %v1080_v51 = vadd.f32 %v1070_v24, %v1069_v18  ;;  %v1075_v38 = vmul.f32 2.0, %v1071_v63 }
 0x1ba   :  { %v779_v56 = vpop.f32.mrb[4].mxu1  ;;  %6237 = vadd.xlane.f32.xlu0 %v6236_v36 }
 0x1bb   :  { %v1072_v57 = vsub.f32 %v779_v56, %v1069_v18  ;;  %v6692_v32 = vpop.f32.mrb[5].mxu1  ;;  %v1081_v42 = vadd.f32 0.0001, %v1080_v51  ;;  %v1076_v35 = vadd.f32 0.0001, %v1075_v38  ;;  %v6249_v18 = vld [vmem:[#allocation3] sm:$0xff] }
 0x1be   :  { %v922_v44 = vpop.f32.mrb[6].mxu1 }
 0x1bf   :  { %v1073_v45 = vsub.f32 %v922_v44, %v1070_v24  ;;  %v6706_v0 = vpop.f32.mrb[7].mxu1  ;;  %v6250_v24 = vld [vmem:[#allocation3 + $0x8] sm:$0xff] }
 0x1c0   :  { %v6252_v2 = vsel %vm76_vm0, %v6250_v24, 0.0 }
 0x1c1   :  { %v1082_v13 = vadd.f32 %v1073_v45, %v1072_v57 }
 0x1c2   :  { %v1065_v50 = vpop.f32.mrb[8].mxu1 }
 0x1c3   :  { %v1083_v43 = vadd.f32 0.0009, %v1082_v13  ;;  %v1074_v26 = vsub.f32 %v1065_v50, %v1071_v63  ;;  %v6720_v33 = vpop.f32.mrb[9].mxu1  ;;  %v6251_v63 = vsel %vm76_vm0, %v6249_v18, 0.0 }
 0x1c4   :  { %v6253_v56 = vadd.f32 %v6252_v2, %v6251_v63 }
 0x1c5   :  { %v1084_v37 = vmul.f32 %v1083_v43, %v1081_v42  ;;  %v1077_v28 = vmul.f32 2.0, %v1074_v26 }
 0x1c6   :  { %v1226_v52 = vpop.f32.mrb[10].mxu1  ;;  %6254 = vadd.xlane.f32.xlu0 %v6253_v56 }
 0x1c7   :  { %7463 = vrcp.f32 %v1084_v37  ;;  %v1078_v47 = vadd.f32 0.0009, %v1077_v28  ;;  %v6734_v61 = vpop.f32.mrb[11].mxu1  ;;  %v1802_v55 = vmul.f32 %v1226_v52, %v1226_v52 }
 0x1c9   :  { %v1079_v4 = vmul.f32 %v1078_v47, %v1076_v35 }
 0x1ca   :  { %v1369_v48 = vpop.f32.mrb[12].mxu1 }
 0x1cb   :  { %v1803_v11 = vmul.f32 %v1369_v48, %v1369_v48  ;;  %v1804_v21 = vmul.f32 %v1369_v48, %v1226_v52  ;;  %v6748_v14 = vpop.f32.mrb[13].mxu1 }
 0x1cd   :  { %v1813_v62 = vadd.f32 %v1803_v11, %v1802_v55  ;;  %v1808_v7 = vmul.f32 2.0, %v1804_v21 }
 0x1ce   :  { %v1512_v6 = vpop.f32.mrb[14].mxu1 }
 0x1cf   :  { %v1805_v22 = vsub.f32 %v1512_v6, %v1802_v55  ;;  %v6762_v3 = vpop.f32.mrb[15].mxu1  ;;  %v1814_v8 = vadd.f32 0.0001, %v1813_v62  ;;  %v1809_v31 = vadd.f32 0.0001, %v1808_v7 }
 0x1d1   :  { %v7464_v9 = vpop.eup %7463 }
 0x1d2   :  { %v1086_v39 = vmul.f32 %v7464_v9, %v1079_v4  ;;  %v1655_v12 = vpop.f32.mrb[16].mxu1 }
 0x1d3   :  { %v1806_v46 = vsub.f32 %v1655_v12, %v1803_v11  ;;  %v6776_v1 = vpop.f32.mrb[17].mxu1 }
 0x1d5   :  { %v1815_v49 = vadd.f32 %v1806_v46, %v1805_v22 }
 0x1d6   :  { %v1798_v40 = vpop.f32.mrb[18].mxu1 }
 0x1d7   :  { %v1816_v23 = vadd.f32 0.0009, %v1815_v49  ;;  %v1807_v30 = vsub.f32 %v1798_v40, %v1804_v21  ;;  %v6790_v15 = vpop.f32.mrb[19].mxu1 }
 0x1d9   :  { %v1817_v16 = vmul.f32 %v1816_v23, %v1814_v8  ;;  %v1810_v17 = vmul.f32 2.0, %v1807_v30 }
 0x1da   :  { %v1960_v34 = vpop.f32.mrb[20].mxu1 }
 0x1db   :  { %7465 = vrcp.f32 %v1817_v16  ;;  %v1811_v53 = vadd.f32 0.0009, %v1810_v17  ;;  %v6804_v54 = vpop.f32.mrb[21].mxu1  ;;  %v2536_v59 = vmul.f32 %v1960_v34, %v1960_v34 }
 0x1dd   :  { %v1812_v58 = vmul.f32 %v1811_v53, %v1809_v31 }
 0x1de   :  { %v2103_v60 = vpop.f32.mrb[22].mxu1 }
 0x1df   :  { %v2537_v25 = vmul.f32 %v2103_v60, %v2103_v60  ;;  %v2538_v19 = vmul.f32 %v2103_v60, %v1960_v34  ;;  %v6818_v41 = vpop.f32.mrb[23].mxu1 }
 0x1e1   :  { %v2547_v5 = vadd.f32 %v2537_v25, %v2536_v59  ;;  %v2542_v26 = vmul.f32 2.0, %v2538_v19 }
 0x1e2   :  { %v2246_v51 = vpop.f32.mrb[24].mxu1 }
 0x1e3   :  { %v2539_v57 = vsub.f32 %v2246_v51, %v2536_v59  ;;  %v6832_v32 = vpop.f32.mrb[25].mxu1  ;;  %v2548_v33 = vadd.f32 0.0001, %v2547_v5  ;;  %v2543_v4 = vadd.f32 0.0001, %v2542_v26 }
 0x1e5   :  { %v7466_v44 = vpop.eup %7465 }
 0x1e6   :  { %v1819_v45 = vmul.f32 %v7466_v44, %v1812_v58  ;;  %v2389_v0 = vpop.f32.mrb[26].mxu1 }
 0x1e7   :  { %v2540_v13 = vsub.f32 %v2389_v0, %v2537_v25  ;;  %v6846_v50 = vpop.f32.mrb[27].mxu1 }
 0x1e8   :  { %v1820_v38 = vadd.f32 %v1819_v45, %v1086_v39 }
 0x1e9   :  { %v2549_v42 = vadd.f32 %v2540_v13, %v2539_v57 }
 0x1ea   :  { %v2532_v43 = vpop.f32.mrb[28].mxu1 }
 0x1eb   :  { %v2550_v37 = vadd.f32 0.0009, %v2549_v42  ;;  %v2541_v28 = vsub.f32 %v2532_v43, %v2538_v19  ;;  %v6860_v52 = vpop.f32.mrb[29].mxu1 }
 0x1ed   :  { %v2551_v35 = vmul.f32 %v2550_v37, %v2548_v33  ;;  %v2544_v47 = vmul.f32 2.0, %v2541_v28 }
 0x1ee   :  { %v2694_v61 = vpop.f32.mrb[30].mxu1 }
 0x1ef   :  { %7467 = vrcp.f32 %v2551_v35  ;;  %v2545_v48 = vadd.f32 0.0009, %v2544_v47  ;;  %v6874_v55 = vpop.f32.mrb[31].mxu1  ;;  %v3270_v14 = vmul.f32 %v2694_v61, %v2694_v61 }
 0x1f1   :  { %v2546_v11 = vmul.f32 %v2545_v48, %v2543_v4 }
 0x1f2   :  { %v2837_v21 = vpop.f32.mrb[32].mxu1 }
 0x1f3   :  { %v3271_v62 = vmul.f32 %v2837_v21, %v2837_v21  ;;  %v3272_v6 = vmul.f32 %v2837_v21, %v2694_v61  ;;  %v6888_v22 = vpop.f32.mrb[33].mxu1 }
 0x1f5   :  { %v3281_v3 = vadd.f32 %v3271_v62, %v3270_v14  ;;  %v3276_v15 = vmul.f32 2.0, %v3272_v6 }
 0x1f6   :  { %v2980_v9 = vpop.f32.mrb[34].mxu1 }
 0x1f7   :  { %v3273_v39 = vsub.f32 %v2980_v9, %v3270_v14  ;;  %v6902_v12 = vpop.f32.mrb[35].mxu1  ;;  %v3282_v16 = vadd.f32 0.0001, %v3281_v3  ;;  %v3277_v59 = vadd.f32 0.0001, %v3276_v15 }
 0x1f9   :  { %v7468_v46 = vpop.eup %7467 }
 0x1fa   :  { %v2553_v1 = vmul.f32 %v7468_v46, %v2546_v11  ;;  %v3123_v49 = vpop.f32.mrb[36].mxu1 }
 0x1fb   :  { %v3274_v40 = vsub.f32 %v3123_v49, %v3271_v62  ;;  %v6916_v7 = vpop.f32.mrb[37].mxu1 }
 0x1fc   :  { %v2554_v8 = vadd.f32 %v2553_v1, %v1820_v38 }
 0x1fd   :  { %v3283_v23 = vadd.f32 %v3274_v40, %v3273_v39 }
 0x1fe   :  { %v3266_v30 = vpop.f32.mrb[38].mxu1 }
 0x1ff   :  { %v3284_v17 = vadd.f32 0.0009, %v3283_v23  ;;  %v3275_v34 = vsub.f32 %v3266_v30, %v3272_v6  ;;  %v6930_v31 = vpop.f32.mrb[39].mxu1 }
 0x201   :  { %v3285_v53 = vmul.f32 %v3284_v17, %v3282_v16  ;;  %v3278_v54 = vmul.f32 2.0, %v3275_v34 }
 0x202   :  { %v3428_v58 = vpop.f32.mrb[40].mxu1 }
 0x203   :  { %7469 = vrcp.f32 %v3285_v53  ;;  %v3279_v60 = vadd.f32 0.0009, %v3278_v54  ;;  %v6944_v10 = vpop.f32.mrb[41].mxu1  ;;  %v4004_v19 = vmul.f32 %v3428_v58, %v3428_v58 }
 0x205   :  { %v3280_v20 = vmul.f32 %v3279_v60, %v3277_v59 }
 0x206   :  { %v3571_v25 = vpop.f32.mrb[42].mxu1 }
 0x207   :  { %v4005_v41 = vmul.f32 %v3571_v25, %v3571_v25  ;;  %v4006_v27 = vmul.f32 %v3571_v25, %v3428_v58  ;;  %v6958_v29 = vpop.f32.mrb[43].mxu1 }
 0x209   :  { %v4015_v36 = vadd.f32 %v4005_v41, %v4004_v19  ;;  %v4010_v0 = vmul.f32 2.0, %v4006_v27 }
 0x20a   :  { %v3714_v18 = vpop.f32.mrb[44].mxu1 }
 0x20b   :  { %v4007_v24 = vsub.f32 %v3714_v18, %v4004_v19  ;;  %v6972_v5 = vpop.f32.mrb[45].mxu1  ;;  %v4016_v13 = vadd.f32 0.0001, %v4015_v36  ;;  %v4011_v37 = vadd.f32 0.0001, %v4010_v0 }
 0x20d   :  { %v7470_v63 = vpop.eup %7469 }
 0x20e   :  { %v3287_v2 = vmul.f32 %v7470_v63, %v3280_v20  ;;  %v3857_v51 = vpop.f32.mrb[46].mxu1 }
 0x20f   :  { %v4008_v56 = vsub.f32 %v3857_v51, %v4005_v41  ;;  %v6986_v57 = vpop.f32.mrb[47].mxu1 }
 0x210   :  { %v3288_v32 = vadd.f32 %v3287_v2, %v2554_v8 }
 0x211   :  { %v4017_v44 = vadd.f32 %v4008_v56, %v4007_v24 }
 0x212   :  { %v4000_v45 = vpop.f32.mrb[48].mxu1 }
 0x213   :  { %v4018_v50 = vadd.f32 0.0009, %v4017_v44  ;;  %v4009_v38 = vsub.f32 %v4000_v45, %v4006_v27  ;;  %v7000_v42 = vpop.f32.mrb[49].mxu1 }
 0x215   :  { %v4019_v43 = vmul.f32 %v4018_v50, %v4016_v13  ;;  %v4012_v26 = vmul.f32 2.0, %v4009_v38 }
 0x216   :  { %v4162_v33 = vpop.f32.mrb[50].mxu1 }
 0x217   :  { %7471 = vrcp.f32 %v4019_v43  ;;  %v4013_v28 = vadd.f32 0.0009, %v4012_v26  ;;  %v7014_v52 = vpop.f32.mrb[51].mxu1  ;;  %v4738_v61 = vmul.f32 %v4162_v33, %v4162_v33 }
 0x219   :  { %v4014_v35 = vmul.f32 %v4013_v28, %v4011_v37 }
 0x21a   :  { %v4305_v47 = vpop.f32.mrb[52].mxu1 }
 0x21b   :  { %v4739_v4 = vmul.f32 %v4305_v47, %v4305_v47  ;;  %v4740_v48 = vmul.f32 %v4305_v47, %v4162_v33  ;;  %v7028_v55 = vpop.f32.mrb[53].mxu1 }
 0x21d   :  { %v4749_v11 = vadd.f32 %v4739_v4, %v4738_v61  ;;  %v4744_v49 = vmul.f32 2.0, %v4740_v48 }
 0x21e   :  { %v4448_v21 = vpop.f32.mrb[54].mxu1 }
 0x21f   :  { %v4741_v14 = vsub.f32 %v4448_v21, %v4738_v61  ;;  %v7042_v62 = vpop.f32.mrb[55].mxu1  ;;  %v4750_v40 = vadd.f32 0.0001, %v4749_v11  ;;  %v4745_v17 = vadd.f32 0.0001, %v4744_v49 }
 0x221   :  { %v7472_v6 = vpop.eup %7471 }
 0x222   :  { %v4021_v22 = vmul.f32 %v7472_v6, %v4014_v35  ;;  %v4591_v3 = vpop.f32.mrb[56].mxu1 }
 0x223   :  { %v4742_v9 = vsub.f32 %v4591_v3, %v4739_v4  ;;  %v7056_v39 = vpop.f32.mrb[57].mxu1 }
 0x224   :  { %v4022_v12 = vadd.f32 %v4021_v22, %v3288_v32 }
 0x225   :  { %v4751_v46 = vadd.f32 %v4742_v9, %v4741_v14 }
 0x226   :  { %v4734_v1 = vpop.f32.mrb[58].mxu1 }
 0x227   :  { %v4752_v7 = vadd.f32 0.0009, %v4751_v46  ;;  %v4743_v8 = vsub.f32 %v4734_v1, %v4740_v48  ;;  %v7070_v23 = vpop.f32.mrb[59].mxu1 }
 0x229   :  { %v4753_v30 = vmul.f32 %v4752_v7, %v4750_v40  ;;  %v4746_v15 = vmul.f32 2.0, %v4743_v8 }
 0x22a   :  { %v4896_v16 = vpop.f32.mrb[60].mxu1 }
 0x22b   :  { %7473 = vrcp.f32 %v4753_v30  ;;  %v4747_v34 = vadd.f32 0.0009, %v4746_v15  ;;  %v7084_v31 = vpop.f32.mrb[61].mxu1  ;;  %v5472_v58 = vmul.f32 %v4896_v16, %v4896_v16  ;;  %v6225_v15 = vld [vmem:[#allocation4] sm:$0x3f] }
 0x22d   :  { %v4748_v53 = vmul.f32 %v4747_v34, %v4745_v17 }
 0x22e   :  { %v5039_v54 = vpop.f32.mrb[62].mxu1 }
 0x22f   :  { %v5473_v59 = vmul.f32 %v5039_v54, %v5039_v54  ;;  %v5474_v60 = vmul.f32 %v5039_v54, %v4896_v16  ;;  %v7098_v10 = vpop.f32.mrb[63].mxu1 }
 0x231   :  { %v5483_v20 = vadd.f32 %v5473_v59, %v5472_v58  ;;  %v5478_v51 = vmul.f32 2.0, %v5474_v60 }
 0x232   :  { %v5182_v25 = vpop.f32.mrb[64].mxu1 }
 0x233   :  { %v5475_v19 = vsub.f32 %v5182_v25, %v5472_v58  ;;  %v7112_v41 = vpop.f32.mrb[65].mxu1  ;;  %v5484_v56 = vadd.f32 0.0001, %v5483_v20  ;;  %v5479_v50 = vadd.f32 0.0001, %v5478_v51 }
 0x235   :  { %v7474_v27 = vpop.eup %7473 }
 0x236   :  { %v4755_v29 = vmul.f32 %v7474_v27, %v4748_v53  ;;  %v5325_v36 = vpop.f32.mrb[66].mxu1 }
 0x237   :  { %v5476_v18 = vsub.f32 %v5325_v36, %v5473_v59  ;;  %v7126_v24 = vpop.f32.mrb[67].mxu1 }
 0x238   :  { %v4756_v5 = vadd.f32 %v4755_v29, %v4022_v12 }
 0x239   :  { %v5485_v63 = vadd.f32 %v5476_v18, %v5475_v19 }
 0x23a   :  { %v5468_v2 = vpop.f32.mrb[68].mxu1 }
 0x23b   :  { %v5486_v57 = vadd.f32 0.0009, %v5485_v63  ;;  %v5477_v32 = vsub.f32 %v5468_v2, %v5474_v60  ;;  %v7140_v44 = vpop.f32.mrb[69].mxu1 }
 0x23d   :  { %v5487_v45 = vmul.f32 %v5486_v57, %v5484_v56  ;;  %v5480_v0 = vmul.f32 2.0, %v5477_v32 }
 0x23e   :  { %v5630_v13 = vpop.f32.mrb[70].mxu1 }
 0x23f   :  { %7475 = vrcp.f32 %v5487_v45  ;;  %v5481_v38 = vadd.f32 0.0009, %v5480_v0  ;;  %v7154_v42 = vpop.f32.mrb[71].mxu1  ;;  %v6206_v33 = vmul.f32 %v5630_v13, %v5630_v13 }
 0x241   :  { %v5482_v43 = vmul.f32 %v5481_v38, %v5479_v50 }
 0x242   :  { %v5773_v26 = vpop.f32.mrb[72].mxu1 }
 0x243   :  { %v6207_v37 = vmul.f32 %v5773_v26, %v5773_v26  ;;  %v6208_v28 = vmul.f32 %v5773_v26, %v5630_v13  ;;  %v7168_v52 = vpop.f32.mrb[73].mxu1 }
 0x245   :  { %v6217_v35 = vadd.f32 %v6207_v37, %v6206_v33  ;;  %v6212_v3 = vmul.f32 2.0, %v6208_v28 }
 0x246   :  { %v5916_v47 = vpop.f32.mrb[74].mxu1 }
 0x247   :  { %v6209_v61 = vsub.f32 %v5916_v47, %v6206_v33  ;;  %v7182_v4 = vpop.f32.mrb[75].mxu1  ;;  %v6218_v9 = vadd.f32 0.0001, %v6217_v35  ;;  %v6213_v40 = vadd.f32 0.0001, %v6212_v3  ;;  %v6238_v53 = vpop.xlane.xlu0 %6237 }
 0x248   :  { %v6239_v54 = vrot.slane %v6238_v53, 4 }
 0x249   :  { %v7476_v48 = vpop.eup %7475 }
 0x24a   :  { %v5489_v55 = vmul.f32 %v7476_v48, %v5482_v43  ;;  %v6059_v11 = vpop.f32.mrb[76].mxu1  ;;  %v6240_v58 = vadd.f32 %v6239_v54, %v6238_v53 }
 0x24b   :  { %v6210_v21 = vsub.f32 %v6059_v11, %v6207_v37  ;;  %v7196_v14 = vpop.f32.mrb[77].mxu1 }
 0x24c   :  { %v5490_v62 = vadd.f32 %v5489_v55, %v4756_v5  ;;  %v6241_v60 = vrot.slane %v6240_v58, 2 }
 0x24d   :  { %v6219_v6 = vadd.f32 %v6210_v21, %v6209_v61 }
 0x24e   :  { %v6202_v22 = vpop.f32.mrb[78].mxu1  ;;  %v6242_v25 = vadd.f32 %v6241_v60, %v6240_v58 }
 0x24f   :  { %v6220_v39 = vadd.f32 0.0009, %v6219_v6  ;;  %v6211_v12 = vsub.f32 %v6202_v22, %v6208_v28  ;;  %v7210_v46 = vpop.f32.mrb[79].mxu1 }
 0x250   :  { %v6243_v41 = vrot.slane %v6242_v25, 1 }
 0x251   :  { %v6221_v1 = vmul.f32 %v6220_v39, %v6218_v9  ;;  %v6214_v49 = vmul.f32 2.0, %v6211_v12 }
 0x252   :  { %v6244_v29 = vadd.f32 %v6243_v41, %v6242_v25 }
 0x253   :  { %7477 = vrcp.f32 %v6221_v1  ;;  %v6215_v7 = vadd.f32 0.0009, %v6214_v49  ;;  %v6255_v59 = vpop.xlane.xlu0 %6254 }
 0x254   :  { %v6256_v10 = vrot.slane %v6255_v59, 4  ;;  %7451 = vpush %v6244_v29 }
 0x255   :  { %v6216_v8 = vmul.f32 %v6215_v7, %v6213_v40 }
 0x256   :  { %v6257_v20 = vadd.f32 %v6256_v10, %v6255_v59 }
 0x258   :  { %v6258_v19 = vrot.slane %v6257_v20, 2 }
 0x25a   :  { %v6259_v27 = vadd.f32 %v6258_v19, %v6257_v20 }
 0x25c   :  { %v6260_v36 = vrot.slane %v6259_v27, 1 }
 0x25d   :  { %v7478_v23 = vpop.eup %7477 }
 0x25e   :  { %v6223_v30 = vmul.f32 %v7478_v23, %v6216_v8  ;;  %v6261_v18 = vadd.f32 %v6260_v36, %v6259_v27 }
 0x260   :  { %v6224_v16 = vadd.f32 %v6223_v30, %v5490_v62  ;;  %7453 = vpush %v6261_v18 }
 0x262   :  { %v6226_v17 = vadd.f32 %v6225_v15, %v6224_v16 }
 0x264   :  { %6228 = vst.msk [vmem:[#allocation4] sm:$0x3f] %vm81_vm2, %v6226_v17 }
 0x26b   :  { %v6265_v34 = vld [vmem:[#allocation4] sm:$0x3f] }
 0x26c   :  { %v6266_v31 = vsel %vm81_vm2, %v6265_v34, 0.0 }
 0x26d   :  { %6267 = vadd.xlane.f32.xlu1 %v6266_v31 }
 0x285   :  { %s7452_s3 = spop %7451 }
 0x286   :  { %v6246_v24 = vstv %s7452_s3 }
 0x287   :  { %6248 = vst.msk [vmem:[#allocation5] sm:$0x1] %vm6247_vm3, %v6246_v24 }
 0x291   :  { %s7454_s14 = spop %7453 }
 0x292   :  { %v6263_v5 = vstv %s7454_s14 }
 0x293   :  { %6264 = vst.msk [vmem:[#allocation7] sm:$0x1] %vm6247_vm3, %v6263_v5 }
 0x294   :  { %7490 = shalt.err (!%p7487_p4)
}
 0x295   :  { %s7491_s23 = scalar_lea.hbm %s8445_s5, 16 }
 0x296   :  { %p7492_p5 = scmp.ne.s32.totalorder %s8445_s5, %s7491_s23  ;;  %p7495_p6 = scmp.lt.u32.totalorder %s7491_s23, %s8445_s5 }
 0x298   :  { %p7497_p7 = pnand %p7495_p6, %p7492_p5 }
 0x29a   :  { %7500 = shalt.err (!%p7497_p7)
}
 0x29b   :  { %6297 = dma.vmem_to_hbm [thread:$0]  %s6295_s16, 16, %s8445_s5, [#allocation8]  }
 0x29c   :  { %s7501_s30 = scalar_lea.vmem %s6285_s18, 16  ;;  %s7505_s7 = scalar_lea.vmem %s6285_s18, 32 }
 0x29d   :  { %p7502_p8 = scmp.ne.s32.totalorder %s6285_s18, %s7501_s30  ;;  %p7506_p9 = scmp.lt.s32.totalorder %s6285_s18, %s6285_s18 }
 0x29e   :  { %p7507_p10 = scmp.lt.s32.totalorder %s7505_s7, %s7501_s30 }
 0x2a0   :  { %p7508_p11 = por %p7507_p10, %p7506_p9 }
 0x2a2   :  { %p7509_p12 = pnand %p7508_p11, %p7502_p8 }
 0x2a4   :  { %7512 = shalt.err (!%p7509_p12)
}
 0x2a5   :  { %s7513_s10 = scalar_lea.hbm %s8444_s4, 16 }
 0x2a6   :  { %p7514_p13 = scmp.ne.s32.totalorder %s8444_s4, %s7513_s10  ;;  %p7517_p0 = scmp.lt.u32.totalorder %s7513_s10, %s8444_s4 }
 0x2a8   :  { %p7519_p1 = pnand %p7517_p0, %p7514_p13 }
 0x2aa   :  { %7522 = shalt.err (!%p7519_p1)
}
 0x2ab   :  { %6287 = dma.vmem_to_hbm [thread:$0]  %s6285_s18, 16, %s8444_s4, [#allocation6]  }
 0x2ac   :  { %s7554_s13 = smov [#allocation9]  }
 0x2ad   :  { %s6304_s3 = sshll.u32 %s7554_s13, 4  ;;  %s6305_s3 = int_to_ptr.vmem [resolvable:$true] %s6304_s3 }
 0x2ae   :  { %s7523_s15 = scalar_lea.vmem %s6305_s3, 16  ;;  %s7527_s16 = scalar_lea.vmem %s6305_s3, 32 }
 0x2af   :  { %p7524_p2 = scmp.ne.s32.totalorder %s6305_s3, %s7523_s15  ;;  %p7528_p3 = scmp.lt.s32.totalorder %s6305_s3, %s6305_s3 }
 0x2b0   :  { %p7529_p4 = scmp.lt.s32.totalorder %s7527_s16, %s7523_s15 }
 0x2b2   :  { %p7530_p5 = por %p7529_p4, %p7528_p3 }
 0x2b4   :  { %p7531_p6 = pnand %p7530_p5, %p7524_p2 }
 0x2fa   :  { %v6268_v63 = vpop.xlane.xlu1 %6267 }
 0x2fb   :  { %v6269_v2 = vrot.slane %v6268_v63, 4 }
 0x2fd   :  { %v6270_v51 = vadd.f32 %v6269_v2, %v6268_v63 }
 0x2ff   :  { %v6271_v56 = vrot.slane %v6270_v51, 2 }
 0x301   :  { %v6272_v57 = vadd.f32 %v6271_v56, %v6270_v51 }
 0x303   :  { %v6273_v32 = vrot.slane %v6272_v57, 1 }
 0x305   :  { %v6274_v44 = vadd.f32 %v6273_v32, %v6272_v57 }
 0x307   :  { %7455 = vpush %v6274_v44 }
 0x338   :  { %s7456_s14 = spop %7455 }
 0x339   :  { %v6276_v45 = vstv %s7456_s14 }
 0x33a   :  { %6277 = vst.msk [vmem:[#allocation9] sm:$0x1] %vm6247_vm3, %v6276_v45 }
 0x33b   :  { %7534 = shalt.err (!%p7531_p6)
}
 0x33c   :  { %s7535_s18 = scalar_lea.hbm %s8446_s6, 16 }
 0x33d   :  { %p7536_p7 = scmp.ne.s32.totalorder %s8446_s6, %s7535_s18  ;;  %p7539_p8 = scmp.lt.u32.totalorder %s7535_s18, %s8446_s6 }
 0x33f   :  { %p7541_p9 = pnand %p7539_p8, %p7536_p7 }
 0x341   :  { %7544 = shalt.err (!%p7541_p9)
}
 0x342   :  { %6307 = dma.vmem_to_hbm [thread:$0]  %s6305_s3, 16, %s8446_s6, [#allocation8]  }
 0x343   :  { %7545 = dma.done.wait [#allocation6], 16  }
 0x344   :  { %7546 = vsyncadd [#allocation6], 4294967280 }
 0x345   :  { %7547 = dma.done.wait [#allocation8], 32  }
 0x346   :  { %7548 = vsyncadd [#allocation8], 4294967264 }
 0x347   :  { %6317 = vsyncpa [#allocation6], 1 }
 0x348   :  { %6318 = vsyncpa [#allocation8], 1 }

</bundles_post_ra>
